<compile_context>
chip_gen: v7x
topology: tpu7x:2x2x1
jax: 0.10.0
libtpu: 0.0.40
codegen_flags: <defaults>
</compile_context>

<pallas_src>
import jax
import jax.numpy as jnp
from jax import lax
from jax.experimental import pallas as pl
from jax.experimental.pallas import tpu as pltpu


# ----------------------------------------------------------------------------
# small helpers
# ----------------------------------------------------------------------------
def _round_up(v, m):
    return ((v + m - 1) // m) * m


def _normalize(w, eps=1e-4):
    # EDM2 `normalize`: per-output-filter unit norm (dims 1..), eps-regularized.
    w32 = w.astype(jnp.float32)
    norm = jnp.sqrt(
        jnp.sum(jnp.square(w32), axis=tuple(range(1, w.ndim)), keepdims=True)
    )
    norm = eps + jnp.sqrt(norm.size / w.size) * norm
    return w32 / norm


# ----------------------------------------------------------------------------
# Pallas kernel factory
# ----------------------------------------------------------------------------
def _make_mpconv_kernel(TS, Cig, TCo, offsets, halo_rows, body_rows):
    """Per grid step:
      xm_ref : (TS, Cig)          main flattened-spatial tile
      xh_ref : (halo_rows, Cig)   halo rows following the tile     [if halo]
      w_ref  : (K*Cig, TCo)       per-(group, cout-tile) weight slab
      o_ref  : (TS, TCo)          output tile
      tail   : (2*halo_rows, Cig) small scratch: [end-of-main | halo]
    """
    K = len(offsets)
    has_halo = halo_rows > 0

    def kernel(*refs):
        if has_halo:
            xm_ref, xh_ref, w_ref, o_ref, tail_ref = refs
        else:
            xm_ref, w_ref, o_ref = refs

        # ---- body: output rows [0, body_rows); all taps read the main tile ----
        # TODO(synk): for Cig==128 on v6e/v7x, folding taps in pairs (contraction
        # 256) via a small staged scratch would halve the accumulator passes.
        acc = None
        for k, off in enumerate(offsets):
            d = jnp.dot(xm_ref[off:off + body_rows, :],
                        w_ref[k * Cig:(k + 1) * Cig, :],
                        preferred_element_type=jnp.float32)
            acc = d if acc is None else acc + d
        o_ref[0:body_rows, :] = acc.astype(o_ref.dtype)

        if has_halo:
            # ---- tail: output rows [body_rows, TS); stage only ~2*HALO rows ----
            tail_ref[0:halo_rows, :] = xm_ref[body_rows:TS, :]
            tail_ref[halo_rows:2 * halo_rows, :] = xh_ref[...]
            tacc = None
            for k, off in enumerate(offsets):
                d = jnp.dot(tail_ref[off:off + halo_rows, :],
                            w_ref[k * Cig:(k + 1) * Cig, :],
                            preferred_element_type=jnp.float32)
                tacc = d if tacc is None else tacc + d
            o_ref[body_rows:TS, :] = tacc.astype(o_ref.dtype)

    return kernel


# ----------------------------------------------------------------------------
# Forward wrapper (matches MPConv2D.forward semantics)
# ----------------------------------------------------------------------------
def mp_conv2d(x_nchw, weight, gain=1.0, groups=1, training=False,
              disable_weight_norm=False, compute_dtype=jnp.bfloat16,
              out_dtype=None, tile_rows=None, tile_cout=None):
    """x_nchw: (N, Cin, H, W); weight: (Cout, Cin//groups, KH, KW)."""
    N, Cin, H, W = x_nchw.shape
    Cout, Cig, KH, KW = weight.shape
    G = groups
    assert Cin == Cig * G and Cout % G == 0
    Cog = Cout // G
    K = KH * KW
    if compute_dtype is None:
        compute_dtype = x_nchw.dtype
    out_dtype = x_nchw.dtype if out_dtype is None else out_dtype

    # ---- weight prep: float(); optional normalize (training); gain scaling ----
    w = weight.astype(jnp.float32)
    if training and not disable_weight_norm:
        w = _normalize(w)
    # gain may be a scalar or any array broadcastable against (Cout, Cig, KH, KW),
    # exactly as in the PyTorch module (same numpy-style broadcast).
    w = w * (jnp.asarray(gain, jnp.float32) / float(Cig * KH * KW) ** 0.5)
    w = w.astype(compute_dtype)

    # Pad the per-group contraction dim to a multiple of 8 (sublane-aligned
    # weight slices; robust lowering for tiny channel counts).  Zero pads do
    # not change the result.
    CigP = _round_up(Cig, 8)
    w_g = w.reshape(G, Cog, Cig, KH, KW)
    if CigP != Cig:
        w_g = jnp.pad(w_g, ((0, 0), (0, 0), (0, CigP - Cig), (0, 0), (0, 0)))
    # (G, Cog, CigP, KH, KW) -> (G, KH*KW*CigP, Cog); contraction idx = (kh*KW+kw)*CigP + ci
    w_k = w_g.transpose(0, 3, 4, 2, 1).reshape(G, K * CigP, Cog)

    # ---- activations: NCHW -> NHWC, reflect pad W, zero pad H, pad W to x8 ----
    # TODO(synk): these layout passes (and the final crop/transpose) each cost a
    # full HBM pass; keeping the surrounding model NHWC / flat-spatial drops them.
    x = jnp.transpose(x_nchw, (0, 2, 3, 1)).astype(compute_dtype)
    pad_h, pad_w = KH // 2, KW // 2
    if pad_w != 0:                   # module: ReflectionPad2d((KW//2, KW//2, 0, 0))
        x = jnp.pad(x, ((0, 0), (0, 0), (pad_w, pad_w), (0, 0)), mode="reflect")
    if pad_h != 0:                   # conv2d(padding=(KH//2, 0))
        x = jnp.pad(x, ((0, 0), (pad_h, pad_h), (0, 0), (0, 0)))
    Hp, Wp = x.shape[1], x.shape[2]
    Ho, Wo = Hp - KH + 1, Wp - KW + 1
    assert Ho >= 1 and Wo >= 1
    Wpp = _round_up(Wp, 8)           # sublane-align the kh*Wpp tap offsets
    if Wpp > Wp:
        x = jnp.pad(x, ((0, 0), (0, 0), (0, Wpp - Wp), (0, 0)))

    # Flat-spatial formulation: s = h*Wpp + w; tap (kh, kw) reads row s + kh*Wpp + kw.
    # Wpp columns are computed per output row; the (Wpp - Wo) garbage columns are
    # cropped afterwards.
    S_out = Ho * Wpp
    HALO = (KH - 1) * Wpp + (KW - 1)
    HALO_pad = _round_up(HALO, 8) if HALO > 0 else 0
    has_halo = HALO_pad > 0

    # ---- spatial tile: whole image rows; halo fraction small; 8-aligned body ----
    if tile_rows is not None:
        rows = max(1, int(tile_rows))
    else:
        rows = max(1, min(max(1024 // Wpp, 1), Ho))
        # TODO(synk): on 128 MiB parts (v5e/v6e) a larger target (2048-4096 flat
        # rows) further amortizes per-step overhead; default stays v7x-safe.
    while rows * Wpp - HALO_pad < 8:
        rows += 1
    TS = rows * Wpp
    nTS = -(-S_out // TS)
    S_pad = nTS * TS
    BODY = TS - HALO_pad if has_halo else TS

    # ---- cout tile ----
    if tile_cout is not None:
        TCo = tile_cout
    elif Cog % 128 != 0 or Cog <= 512:
        TCo = Cog
    elif Cog % 256 == 0:
        TCo = 256
    else:
        TCo = 128
    assert Cog % TCo == 0 and (TCo == Cog or TCo % 128 == 0)
    nCO = Cog // TCo

    # (N, Hp, Wpp, Cin) -> (N, G, rows, CigP), zero-padded so tiles + halo are in range.
    xg = (x.reshape(N, Hp, Wpp, G, Cig)
           .transpose(0, 3, 1, 2, 4)
           .reshape(N, G, Hp * Wpp, Cig))
    if CigP != Cig:
        xg = jnp.pad(xg, ((0, 0), (0, 0), (0, 0), (0, CigP - Cig)))
    rows_needed = S_pad + (TS if has_halo else 0)
    if rows_needed > Hp * Wpp:
        xg = jnp.pad(xg, ((0, 0), (0, 0), (0, rows_needed - Hp * Wpp), (0, 0)))

    x_main = xg[:, :, :S_pad, :]
    if has_halo:
        # HALO_pad rows following each tile, via strided slice+reshape (no gather HLO).
        x_halo = (xg[:, :, TS:TS + S_pad, :]
                  .reshape(N, G, nTS, TS, CigP)[:, :, :, :HALO_pad, :]
                  .reshape(N, G, nTS * HALO_pad, CigP))

    # ---- grid order: keep the more re-streamed operand VMEM-resident ----
    itm_c = jnp.dtype(compute_dtype).itemsize
    itm_o = jnp.dtype(out_dtype).itemsize
    in_bytes = N * G * (S_pad + nTS * HALO_pad) * CigP * itm_c
    w_bytes = G * K * CigP * Cog * itm_c
    out_bytes = G * N * S_pad * Cog * itm_o
    co_inner = nCO > 1 and (N * nTS - 1) * w_bytes < (nCO - 1) * in_bytes

    if co_inner:
        grid = (G, N, nTS, nCO)
        x_idx = lambda g, n, t, co: (n, g, t, 0)
        w_idx = lambda g, n, t, co: (g, 0, co)
        o_idx = lambda g, n, t, co: (g, n, t, co)
        bytes_accessed = in_bytes + w_bytes * N * nTS + out_bytes
    else:
        grid = (G, nCO, N, nTS)
        x_idx = lambda g, co, n, t: (n, g, t, 0)
        w_idx = lambda g, co, n, t: (g, 0, co)
        o_idx = lambda g, co, n, t: (g, n, t, co)
        bytes_accessed = in_bytes * nCO + w_bytes + out_bytes
    # TODO(synk): on v7x verify Mosaic core-splits a >1-extent parallel axis when
    # the leading grid axes have extent 1 (otherwise add an explicit core axis).

    inputs = [x_main]
    in_specs = [pl.BlockSpec((None, None, TS, CigP), x_idx)]
    if has_halo:
        inputs.append(x_halo)
        in_specs.append(pl.BlockSpec((None, None, HALO_pad, CigP), x_idx))
    inputs.append(w_k)
    in_specs.append(pl.BlockSpec((None, K * CigP, TCo), w_idx))

    out_spec = pl.BlockSpec((None, None, TS, TCo), o_idx)
    out_shape = jax.ShapeDtypeStruct((G, N, S_pad, Cog), out_dtype)

    offsets = [kh * Wpp + kw for kh in range(KH) for kw in range(KW)]
    kernel = _make_mpconv_kernel(TS, CigP, TCo, offsets, HALO_pad, BODY)

    scratch = ([pltpu.VMEM((2 * HALO_pad, CigP), compute_dtype)]
               if has_halo else [])

    # ---- VMEM budget from the actual per-step footprint (v7x-safe cap) ----
    footprint = (2 * (TS * CigP + HALO_pad * CigP + K * CigP * TCo) * itm_c
                 + 2 * TS * TCo * itm_o
                 + 2 * HALO_pad * CigP * itm_c
                 + 3 * TS * TCo * 4)                 # f32 accumulation headroom
    vmem_limit = int(min(max(footprint + (8 << 20), 24 << 20), 48 << 20))

    flops = 2 * G * N * S_pad * K * CigP * Cog

    out_flat = pl.pallas_call(
        kernel,
        out_shape=out_shape,
        grid_spec=pltpu.PrefetchScalarGridSpec(
            num_scalar_prefetch=0,
            grid=grid,
            in_specs=in_specs,
            out_specs=out_spec,
            scratch_shapes=scratch,
        ),
        compiler_params=pltpu.CompilerParams(
            dimension_semantics=("parallel", "parallel", "parallel", "parallel"),
            vmem_limit_bytes=vmem_limit,
        ),
        cost_estimate=pl.CostEstimate(
            flops=int(flops), transcendentals=0,
            bytes_accessed=int(bytes_accessed)),
    )(*inputs)

    # Crop padded rows + garbage columns, merge groups, restore NCHW.
    out_g = out_flat[:, :, :S_out, :].reshape(G, N, Ho, Wpp, Cog)[:, :, :, :Wo, :]
    if G == 1:
        out_nhwc = out_g[0]
    else:
        out_nhwc = jnp.transpose(out_g, (1, 2, 3, 0, 4)).reshape(N, Ho, Wo, Cout)
    # TODO(synk): for grouped convs with Cog < 128 the output lane dim stays narrow
    # (masked stores); packing several groups into one lane-dense block is not done.
    return jnp.transpose(out_nhwc, (0, 3, 1, 2))


# ----------------------------------------------------------------------------
# Pure-XLA reference (same bf16 quantization, f32 accumulation)
# ----------------------------------------------------------------------------
def _reference_conv(x, weight, gain, groups, training, compute_dtype):
    Cout, Cig, KH, KW = weight.shape
    w = weight.astype(jnp.float32)
    if training:
        w = _normalize(w)
    w = w * (jnp.asarray(gain, jnp.float32) / float(Cig * KH * KW) ** 0.5)
    w = w.astype(compute_dtype).astype(jnp.float32)
    xr = x.astype(compute_dtype).astype(jnp.float32)
    if KW // 2 != 0:
        xr = jnp.pad(xr, ((0, 0), (0, 0), (0, 0), (KW // 2, KW // 2)),
                     mode="reflect")
    out = lax.conv_general_dilated(
        xr, w, window_strides=(1, 1), padding=((KH // 2, KH // 2), (0, 0)),
        dimension_numbers=("NCHW", "OIHW", "NCHW"),
        feature_group_count=groups,
        preferred_element_type=jnp.float32,
        precision=lax.Precision.HIGHEST)
    return out.astype(x.dtype)


# ----------------------------------------------------------------------------
# Demo / correctness check
# ----------------------------------------------------------------------------
if __name__ == "__main__":
    key = jax.random.PRNGKey(0)

    cases = [
        # small baseline, multiple spatial tiles (halo + tail path)
        dict(name="3x3_tiled", N=2, Cin=4, Cout=8, H=16, W=16, KH=3, KW=3,
             groups=1, tile_rows=6, training=False),
        # grouped conv + training-mode weight normalization
        dict(name="3x3_g2_train", N=2, Cin=8, Cout=8, H=16, W=16, KH=3, KW=3,
             groups=2, tile_rows=None, training=True),
        # 128-aligned channels, multiple spatial tiles
        dict(name="3x3_c128", N=1, Cin=128, Cout=128, H=8, W=8, KH=3, KW=3,
             groups=1, tile_rows=4, training=False),
        # 1x1 conv (no reflect pad, no halo)
        dict(name="1x1", N=2, Cin=8, Cout=8, H=16, W=16, KH=1, KW=1,
             groups=1, tile_rows=None, training=False),
        # wide image at realistic channel count
        dict(name="3x3_wide_c256", N=1, Cin=256, Cout=256, H=12, W=64, KH=3, KW=3,
             groups=1, tile_rows=None, training=False),
    ]

    for i, c in enumerate(cases):
        kx, kw_ = jax.random.split(jax.random.fold_in(key, i))
        x = jax.random.normal(kx, (c["N"], c["Cin"], c["H"], c["W"]), jnp.float32)
        weight = jax.random.normal(
            kw_, (c["Cout"], c["Cin"] // c["groups"], c["KH"], c["KW"]), jnp.float32)

        fn = jax.jit(lambda xx, ww, c=c: mp_conv2d(
            xx, ww, gain=1.0, groups=c["groups"], training=c["training"],
            tile_rows=c["tile_rows"]))
        out = jax.block_until_ready(fn(x, weight))

        ref = _reference_conv(x, weight, 1.0, c["groups"], c["training"],
                              jnp.bfloat16)
        assert out.shape == ref.shape, (c["name"], out.shape, ref.shape)
        err = float(jnp.max(jnp.abs(out - ref)))
        assert err < 2e-3, (c["name"], err)

    print("KERNEL_OK")
</pallas_src>

<mosaic_0001>
module attributes {stable_mosaic.version = 11 : i64} {
  func.func @kernel(%arg0: i32, %arg1: i32, %arg2: i32, %arg3: i32, %arg4: memref<1x1x144x8xbf16, #tpu.memory_space<vmem>>, %arg5: memref<1x1x56x8xbf16, #tpu.memory_space<vmem>>, %arg6: memref<1x72x8xbf16, #tpu.memory_space<vmem>>, %arg7: memref<1x1x144x8xf32, #tpu.memory_space<vmem>>, %arg8: memref<112x8xbf16, #tpu.memory_space<vmem>>) attributes {dimension_semantics = [#tpu.dimension_semantics<parallel>, #tpu.dimension_semantics<parallel>, #tpu.dimension_semantics<parallel>, #tpu.dimension_semantics<parallel>], iteration_bounds = array<i64: 1, 1, 2, 3>, scalar_prefetch = 0 : i64, scratch_operands = 1 : i64, tpu.core_type = #tpu.core_type<tc>, window_params = [{transform_indices = @transform_0, window_bounds = array<i64: 1, 1, 144, 8>}, {transform_indices = @transform_1, window_bounds = array<i64: 1, 1, 56, 8>}, {transform_indices = @transform_2, window_bounds = array<i64: 1, 72, 8>}, {transform_indices = @transform_3, window_bounds = array<i64: 1, 1, 144, 8>}]} {
    %c0 = arith.constant 0 : index
    %c0_0 = arith.constant 0 : index
    %c0_1 = arith.constant 0 : index
    %c0_2 = arith.constant 0 : index
    %0 = vector.load %arg4[%c0, %c0_0, %c0_1, %c0_2] : memref<1x1x144x8xbf16, #tpu.memory_space<vmem>>, vector<1x1x88x8xbf16>
    %1 = vector.shape_cast %0 : vector<1x1x88x8xbf16> to vector<88x8xbf16>
    %c0_3 = arith.constant 0 : index
    %c0_4 = arith.constant 0 : index
    %c0_5 = arith.constant 0 : index
    %2 = vector.load %arg6[%c0_3, %c0_4, %c0_5] : memref<1x72x8xbf16, #tpu.memory_space<vmem>>, vector<1x8x8xbf16>
    %3 = vector.shape_cast %2 : vector<1x8x8xbf16> to vector<8x8xbf16>
    %cst = arith.constant dense<0.000000e+00> : vector<88x8xf32>
    %4 = tpu.matmul %1, %3, %cst {dimension_numbers = #tpu.dot_dimension_numbers<[1], [0], [0], [1], [0, 0, 1, 1], [], []>} : vector<88x8xbf16>, vector<8x8xbf16>, vector<88x8xf32> -> vector<88x8xf32>
    %c0_6 = arith.constant 0 : index
    %c0_7 = arith.constant 0 : index
    %c1 = arith.constant 1 : index
    %c0_8 = arith.constant 0 : index
    %5 = vector.load %arg4[%c0_6, %c0_7, %c1, %c0_8] : memref<1x1x144x8xbf16, #tpu.memory_space<vmem>>, vector<1x1x88x8xbf16>
    %6 = vector.shape_cast %5 : vector<1x1x88x8xbf16> to vector<88x8xbf16>
    %c0_9 = arith.constant 0 : index
    %c8 = arith.constant 8 : index
    %c0_10 = arith.constant 0 : index
    %7 = vector.load %arg6[%c0_9, %c8, %c0_10] : memref<1x72x8xbf16, #tpu.memory_space<vmem>>, vector<1x8x8xbf16>
    %8 = vector.shape_cast %7 : vector<1x8x8xbf16> to vector<8x8xbf16>
    %cst_11 = arith.constant dense<0.000000e+00> : vector<88x8xf32>
    %9 = tpu.matmul %6, %8, %cst_11 {dimension_numbers = #tpu.dot_dimension_numbers<[1], [0], [0], [1], [0, 0, 1, 1], [], []>} : vector<88x8xbf16>, vector<8x8xbf16>, vector<88x8xf32> -> vector<88x8xf32>
    %10 = arith.addf %4, %9 : vector<88x8xf32>
    %c0_12 = arith.constant 0 : index
    %c0_13 = arith.constant 0 : index
    %c2 = arith.constant 2 : index
    %c0_14 = arith.constant 0 : index
    %11 = vector.load %arg4[%c0_12, %c0_13, %c2, %c0_14] : memref<1x1x144x8xbf16, #tpu.memory_space<vmem>>, vector<1x1x88x8xbf16>
    %12 = vector.shape_cast %11 : vector<1x1x88x8xbf16> to vector<88x8xbf16>
    %c0_15 = arith.constant 0 : index
    %c16 = arith.constant 16 : index
    %c0_16 = arith.constant 0 : index
    %13 = vector.load %arg6[%c0_15, %c16, %c0_16] : memref<1x72x8xbf16, #tpu.memory_space<vmem>>, vector<1x8x8xbf16>
    %14 = vector.shape_cast %13 : vector<1x8x8xbf16> to vector<8x8xbf16>
    %cst_17 = arith.constant dense<0.000000e+00> : vector<88x8xf32>
    %15 = tpu.matmul %12, %14, %cst_17 {dimension_numbers = #tpu.dot_dimension_numbers<[1], [0], [0], [1], [0, 0, 1, 1], [], []>} : vector<88x8xbf16>, vector<8x8xbf16>, vector<88x8xf32> -> vector<88x8xf32>
    %16 = arith.addf %10, %15 : vector<88x8xf32>
    %c0_18 = arith.constant 0 : index
    %c0_19 = arith.constant 0 : index
    %c24 = arith.constant 24 : index
    %c0_20 = arith.constant 0 : index
    %17 = vector.load %arg4[%c0_18, %c0_19, %c24, %c0_20] : memref<1x1x144x8xbf16, #tpu.memory_space<vmem>>, vector<1x1x88x8xbf16>
    %18 = vector.shape_cast %17 : vector<1x1x88x8xbf16> to vector<88x8xbf16>
    %c0_21 = arith.constant 0 : index
    %c24_22 = arith.constant 24 : index
    %c0_23 = arith.constant 0 : index
    %19 = vector.load %arg6[%c0_21, %c24_22, %c0_23] : memref<1x72x8xbf16, #tpu.memory_space<vmem>>, vector<1x8x8xbf16>
    %20 = vector.shape_cast %19 : vector<1x8x8xbf16> to vector<8x8xbf16>
    %cst_24 = arith.constant dense<0.000000e+00> : vector<88x8xf32>
    %21 = tpu.matmul %18, %20, %cst_24 {dimension_numbers = #tpu.dot_dimension_numbers<[1], [0], [0], [1], [0, 0, 1, 1], [], []>} : vector<88x8xbf16>, vector<8x8xbf16>, vector<88x8xf32> -> vector<88x8xf32>
    %22 = arith.addf %16, %21 : vector<88x8xf32>
    %c0_25 = arith.constant 0 : index
    %c0_26 = arith.constant 0 : index
    %c25 = arith.constant 25 : index
    %c0_27 = arith.constant 0 : index
    %23 = vector.load %arg4[%c0_25, %c0_26, %c25, %c0_27] : memref<1x1x144x8xbf16, #tpu.memory_space<vmem>>, vector<1x1x88x8xbf16>
    %24 = vector.shape_cast %23 : vector<1x1x88x8xbf16> to vector<88x8xbf16>
    %c0_28 = arith.constant 0 : index
    %c32 = arith.constant 32 : index
    %c0_29 = arith.constant 0 : index
    %25 = vector.load %arg6[%c0_28, %c32, %c0_29] : memref<1x72x8xbf16, #tpu.memory_space<vmem>>, vector<1x8x8xbf16>
    %26 = vector.shape_cast %25 : vector<1x8x8xbf16> to vector<8x8xbf16>
    %cst_30 = arith.constant dense<0.000000e+00> : vector<88x8xf32>
    %27 = tpu.matmul %24, %26, %cst_30 {dimension_numbers = #tpu.dot_dimension_numbers<[1], [0], [0], [1], [0, 0, 1, 1], [], []>} : vector<88x8xbf16>, vector<8x8xbf16>, vector<88x8xf32> -> vector<88x8xf32>
    %28 = arith.addf %22, %27 : vector<88x8xf32>
    %c0_31 = arith.constant 0 : index
    %c0_32 = arith.constant 0 : index
    %c26 = arith.constant 26 : index
    %c0_33 = arith.constant 0 : index
    %29 = vector.load %arg4[%c0_31, %c0_32, %c26, %c0_33] : memref<1x1x144x8xbf16, #tpu.memory_space<vmem>>, vector<1x1x88x8xbf16>
    %30 = vector.shape_cast %29 : vector<1x1x88x8xbf16> to vector<88x8xbf16>
    %c0_34 = arith.constant 0 : index
    %c40 = arith.constant 40 : index
    %c0_35 = arith.constant 0 : index
    %31 = vector.load %arg6[%c0_34, %c40, %c0_35] : memref<1x72x8xbf16, #tpu.memory_space<vmem>>, vector<1x8x8xbf16>
    %32 = vector.shape_cast %31 : vector<1x8x8xbf16> to vector<8x8xbf16>
    %cst_36 = arith.constant dense<0.000000e+00> : vector<88x8xf32>
    %33 = tpu.matmul %30, %32, %cst_36 {dimension_numbers = #tpu.dot_dimension_numbers<[1], [0], [0], [1], [0, 0, 1, 1], [], []>} : vector<88x8xbf16>, vector<8x8xbf16>, vector<88x8xf32> -> vector<88x8xf32>
    %34 = arith.addf %28, %33 : vector<88x8xf32>
    %c0_37 = arith.constant 0 : index
    %c0_38 = arith.constant 0 : index
    %c48 = arith.constant 48 : index
    %c0_39 = arith.constant 0 : index
    %35 = vector.load %arg4[%c0_37, %c0_38, %c48, %c0_39] : memref<1x1x144x8xbf16, #tpu.memory_space<vmem>>, vector<1x1x88x8xbf16>
    %36 = vector.shape_cast %35 : vector<1x1x88x8xbf16> to vector<88x8xbf16>
    %c0_40 = arith.constant 0 : index
    %c48_41 = arith.constant 48 : index
    %c0_42 = arith.constant 0 : index
    %37 = vector.load %arg6[%c0_40, %c48_41, %c0_42] : memref<1x72x8xbf16, #tpu.memory_space<vmem>>, vector<1x8x8xbf16>
    %38 = vector.shape_cast %37 : vector<1x8x8xbf16> to vector<8x8xbf16>
    %cst_43 = arith.constant dense<0.000000e+00> : vector<88x8xf32>
    %39 = tpu.matmul %36, %38, %cst_43 {dimension_numbers = #tpu.dot_dimension_numbers<[1], [0], [0], [1], [0, 0, 1, 1], [], []>} : vector<88x8xbf16>, vector<8x8xbf16>, vector<88x8xf32> -> vector<88x8xf32>
    %40 = arith.addf %34, %39 : vector<88x8xf32>
    %c0_44 = arith.constant 0 : index
    %c0_45 = arith.constant 0 : index
    %c49 = arith.constant 49 : index
    %c0_46 = arith.constant 0 : index
    %41 = vector.load %arg4[%c0_44, %c0_45, %c49, %c0_46] : memref<1x1x144x8xbf16, #tpu.memory_space<vmem>>, vector<1x1x88x8xbf16>
    %42 = vector.shape_cast %41 : vector<1x1x88x8xbf16> to vector<88x8xbf16>
    %c0_47 = arith.constant 0 : index
    %c56 = arith.constant 56 : index
    %c0_48 = arith.constant 0 : index
    %43 = vector.load %arg6[%c0_47, %c56, %c0_48] : memref<1x72x8xbf16, #tpu.memory_space<vmem>>, vector<1x8x8xbf16>
    %44 = vector.shape_cast %43 : vector<1x8x8xbf16> to vector<8x8xbf16>
    %cst_49 = arith.constant dense<0.000000e+00> : vector<88x8xf32>
    %45 = tpu.matmul %42, %44, %cst_49 {dimension_numbers = #tpu.dot_dimension_numbers<[1], [0], [0], [1], [0, 0, 1, 1], [], []>} : vector<88x8xbf16>, vector<8x8xbf16>, vector<88x8xf32> -> vector<88x8xf32>
    %46 = arith.addf %40, %45 : vector<88x8xf32>
    %c0_50 = arith.constant 0 : index
    %c0_51 = arith.constant 0 : index
    %c50 = arith.constant 50 : index
    %c0_52 = arith.constant 0 : index
    %47 = vector.load %arg4[%c0_50, %c0_51, %c50, %c0_52] : memref<1x1x144x8xbf16, #tpu.memory_space<vmem>>, vector<1x1x88x8xbf16>
    %48 = vector.shape_cast %47 : vector<1x1x88x8xbf16> to vector<88x8xbf16>
    %c0_53 = arith.constant 0 : index
    %c64 = arith.constant 64 : index
    %c0_54 = arith.constant 0 : index
    %49 = vector.load %arg6[%c0_53, %c64, %c0_54] : memref<1x72x8xbf16, #tpu.memory_space<vmem>>, vector<1x8x8xbf16>
    %50 = vector.shape_cast %49 : vector<1x8x8xbf16> to vector<8x8xbf16>
    %cst_55 = arith.constant dense<0.000000e+00> : vector<88x8xf32>
    %51 = tpu.matmul %48, %50, %cst_55 {dimension_numbers = #tpu.dot_dimension_numbers<[1], [0], [0], [1], [0, 0, 1, 1], [], []>} : vector<88x8xbf16>, vector<8x8xbf16>, vector<88x8xf32> -> vector<88x8xf32>
    %52 = arith.addf %46, %51 : vector<88x8xf32>
    %c0_56 = arith.constant 0 : index
    %c0_57 = arith.constant 0 : index
    %c0_58 = arith.constant 0 : index
    %c0_59 = arith.constant 0 : index
    %53 = vector.load %arg7[%c0_56, %c0_57, %c0_58, %c0_59] : memref<1x1x144x8xf32, #tpu.memory_space<vmem>>, vector<1x1x88x8xf32>
    %54 = vector.shape_cast %53 : vector<1x1x88x8xf32> to vector<88x8xf32>
    %55 = vector.shape_cast %52 : vector<88x8xf32> to vector<1x1x88x8xf32>
    tpu.vector_store %arg7[%c0_56, %c0_57, %c0_58, %c0_59], %55 {strides = array<i32>} : memref<1x1x144x8xf32, #tpu.memory_space<vmem>>, vector<1x1x88x8xf32>,
    %c0_60 = arith.constant 0 : index
    %c0_61 = arith.constant 0 : index
    %c88 = arith.constant 88 : index
    %c0_62 = arith.constant 0 : index
    %56 = vector.load %arg4[%c0_60, %c0_61, %c88, %c0_62] : memref<1x1x144x8xbf16, #tpu.memory_space<vmem>>, vector<1x1x56x8xbf16>
    %57 = vector.shape_cast %56 : vector<1x1x56x8xbf16> to vector<56x8xbf16>
    %c0_63 = arith.constant 0 : index
    %c0_64 = arith.constant 0 : index
    %58 = vector.load %arg8[%c0_63, %c0_64] : memref<112x8xbf16, #tpu.memory_space<vmem>>, vector<56x8xbf16>
    tpu.vector_store %arg8[%c0_63, %c0_64], %57 {strides = array<i32>} : memref<112x8xbf16, #tpu.memory_space<vmem>>, vector<56x8xbf16>,
    %c0_65 = arith.constant 0 : index
    %c0_66 = arith.constant 0 : index
    %c0_67 = arith.constant 0 : index
    %c0_68 = arith.constant 0 : index
    %59 = vector.load %arg5[%c0_65, %c0_66, %c0_67, %c0_68] : memref<1x1x56x8xbf16, #tpu.memory_space<vmem>>, vector<1x1x56x8xbf16>
    %60 = vector.shape_cast %59 : vector<1x1x56x8xbf16> to vector<56x8xbf16>
    %c56_69 = arith.constant 56 : index
    %c0_70 = arith.constant 0 : index
    %61 = vector.load %arg8[%c56_69, %c0_70] : memref<112x8xbf16, #tpu.memory_space<vmem>>, vector<56x8xbf16>
    tpu.vector_store %arg8[%c56_69, %c0_70], %60 {strides = array<i32>} : memref<112x8xbf16, #tpu.memory_space<vmem>>, vector<56x8xbf16>,
    %c0_71 = arith.constant 0 : index
    %c0_72 = arith.constant 0 : index
    %62 = vector.load %arg8[%c0_71, %c0_72] : memref<112x8xbf16, #tpu.memory_space<vmem>>, vector<56x8xbf16>
    %c0_73 = arith.constant 0 : index
    %c0_74 = arith.constant 0 : index
    %c0_75 = arith.constant 0 : index
    %63 = vector.load %arg6[%c0_73, %c0_74, %c0_75] : memref<1x72x8xbf16, #tpu.memory_space<vmem>>, vector<1x8x8xbf16>
    %64 = vector.shape_cast %63 : vector<1x8x8xbf16> to vector<8x8xbf16>
    %cst_76 = arith.constant dense<0.000000e+00> : vector<56x8xf32>
    %65 = tpu.matmul %62, %64, %cst_76 {dimension_numbers = #tpu.dot_dimension_numbers<[1], [0], [0], [1], [0, 0, 1, 1], [], []>} : vector<56x8xbf16>, vector<8x8xbf16>, vector<56x8xf32> -> vector<56x8xf32>
    %c1_77 = arith.constant 1 : index
    %c0_78 = arith.constant 0 : index
    %66 = vector.load %arg8[%c1_77, %c0_78] : memref<112x8xbf16, #tpu.memory_space<vmem>>, vector<56x8xbf16>
    %c0_79 = arith.constant 0 : index
    %c8_80 = arith.constant 8 : index
    %c0_81 = arith.constant 0 : index
    %67 = vector.load %arg6[%c0_79, %c8_80, %c0_81] : memref<1x72x8xbf16, #tpu.memory_space<vmem>>, vector<1x8x8xbf16>
    %68 = vector.shape_cast %67 : vector<1x8x8xbf16> to vector<8x8xbf16>
    %cst_82 = arith.constant dense<0.000000e+00> : vector<56x8xf32>
    %69 = tpu.matmul %66, %68, %cst_82 {dimension_numbers = #tpu.dot_dimension_numbers<[1], [0], [0], [1], [0, 0, 1, 1], [], []>} : vector<56x8xbf16>, vector<8x8xbf16>, vector<56x8xf32> -> vector<56x8xf32>
    %70 = arith.addf %65, %69 : vector<56x8xf32>
    %c2_83 = arith.constant 2 : index
    %c0_84 = arith.constant 0 : index
    %71 = vector.load %arg8[%c2_83, %c0_84] : memref<112x8xbf16, #tpu.memory_space<vmem>>, vector<56x8xbf16>
    %c0_85 = arith.constant 0 : index
    %c16_86 = arith.constant 16 : index
    %c0_87 = arith.constant 0 : index
    %72 = vector.load %arg6[%c0_85, %c16_86, %c0_87] : memref<1x72x8xbf16, #tpu.memory_space<vmem>>, vector<1x8x8xbf16>
    %73 = vector.shape_cast %72 : vector<1x8x8xbf16> to vector<8x8xbf16>
    %cst_88 = arith.constant dense<0.000000e+00> : vector<56x8xf32>
    %74 = tpu.matmul %71, %73, %cst_88 {dimension_numbers = #tpu.dot_dimension_numbers<[1], [0], [0], [1], [0, 0, 1, 1], [], []>} : vector<56x8xbf16>, vector<8x8xbf16>, vector<56x8xf32> -> vector<56x8xf32>
    %75 = arith.addf %70, %74 : vector<56x8xf32>
    %c24_89 = arith.constant 24 : index
    %c0_90 = arith.constant 0 : index
    %76 = vector.load %arg8[%c24_89, %c0_90] : memref<112x8xbf16, #tpu.memory_space<vmem>>, vector<56x8xbf16>
    %c0_91 = arith.constant 0 : index
    %c24_92 = arith.constant 24 : index
    %c0_93 = arith.constant 0 : index
    %77 = vector.load %arg6[%c0_91, %c24_92, %c0_93] : memref<1x72x8xbf16, #tpu.memory_space<vmem>>, vector<1x8x8xbf16>
    %78 = vector.shape_cast %77 : vector<1x8x8xbf16> to vector<8x8xbf16>
    %cst_94 = arith.constant dense<0.000000e+00> : vector<56x8xf32>
    %79 = tpu.matmul %76, %78, %cst_94 {dimension_numbers = #tpu.dot_dimension_numbers<[1], [0], [0], [1], [0, 0, 1, 1], [], []>} : vector<56x8xbf16>, vector<8x8xbf16>, vector<56x8xf32> -> vector<56x8xf32>
    %80 = arith.addf %75, %79 : vector<56x8xf32>
    %c25_95 = arith.constant 25 : index
    %c0_96 = arith.constant 0 : index
    %81 = vector.load %arg8[%c25_95, %c0_96] : memref<112x8xbf16, #tpu.memory_space<vmem>>, vector<56x8xbf16>
    %c0_97 = arith.constant 0 : index
    %c32_98 = arith.constant 32 : index
    %c0_99 = arith.constant 0 : index
    %82 = vector.load %arg6[%c0_97, %c32_98, %c0_99] : memref<1x72x8xbf16, #tpu.memory_space<vmem>>, vector<1x8x8xbf16>
    %83 = vector.shape_cast %82 : vector<1x8x8xbf16> to vector<8x8xbf16>
    %cst_100 = arith.constant dense<0.000000e+00> : vector<56x8xf32>
    %84 = tpu.matmul %81, %83, %cst_100 {dimension_numbers = #tpu.dot_dimension_numbers<[1], [0], [0], [1], [0, 0, 1, 1], [], []>} : vector<56x8xbf16>, vector<8x8xbf16>, vector<56x8xf32> -> vector<56x8xf32>
    %85 = arith.addf %80, %84 : vector<56x8xf32>
    %c26_101 = arith.constant 26 : index
    %c0_102 = arith.constant 0 : index
    %86 = vector.load %arg8[%c26_101, %c0_102] : memref<112x8xbf16, #tpu.memory_space<vmem>>, vector<56x8xbf16>
    %c0_103 = arith.constant 0 : index
    %c40_104 = arith.constant 40 : index
    %c0_105 = arith.constant 0 : index
    %87 = vector.load %arg6[%c0_103, %c40_104, %c0_105] : memref<1x72x8xbf16, #tpu.memory_space<vmem>>, vector<1x8x8xbf16>
    %88 = vector.shape_cast %87 : vector<1x8x8xbf16> to vector<8x8xbf16>
    %cst_106 = arith.constant dense<0.000000e+00> : vector<56x8xf32>
    %89 = tpu.matmul %86, %88, %cst_106 {dimension_numbers = #tpu.dot_dimension_numbers<[1], [0], [0], [1], [0, 0, 1, 1], [], []>} : vector<56x8xbf16>, vector<8x8xbf16>, vector<56x8xf32> -> vector<56x8xf32>
    %90 = arith.addf %85, %89 : vector<56x8xf32>
    %c48_107 = arith.constant 48 : index
    %c0_108 = arith.constant 0 : index
    %91 = vector.load %arg8[%c48_107, %c0_108] : memref<112x8xbf16, #tpu.memory_space<vmem>>, vector<56x8xbf16>
    %c0_109 = arith.constant 0 : index
    %c48_110 = arith.constant 48 : index
    %c0_111 = arith.constant 0 : index
    %92 = vector.load %arg6[%c0_109, %c48_110, %c0_111] : memref<1x72x8xbf16, #tpu.memory_space<vmem>>, vector<1x8x8xbf16>
    %93 = vector.shape_cast %92 : vector<1x8x8xbf16> to vector<8x8xbf16>
    %cst_112 = arith.constant dense<0.000000e+00> : vector<56x8xf32>
    %94 = tpu.matmul %91, %93, %cst_112 {dimension_numbers = #tpu.dot_dimension_numbers<[1], [0], [0], [1], [0, 0, 1, 1], [], []>} : vector<56x8xbf16>, vector<8x8xbf16>, vector<56x8xf32> -> vector<56x8xf32>
    %95 = arith.addf %90, %94 : vector<56x8xf32>
    %c49_113 = arith.constant 49 : index
    %c0_114 = arith.constant 0 : index
    %96 = vector.load %arg8[%c49_113, %c0_114] : memref<112x8xbf16, #tpu.memory_space<vmem>>, vector<56x8xbf16>
    %c0_115 = arith.constant 0 : index
    %c56_116 = arith.constant 56 : index
    %c0_117 = arith.constant 0 : index
    %97 = vector.load %arg6[%c0_115, %c56_116, %c0_117] : memref<1x72x8xbf16, #tpu.memory_space<vmem>>, vector<1x8x8xbf16>
    %98 = vector.shape_cast %97 : vector<1x8x8xbf16> to vector<8x8xbf16>
    %cst_118 = arith.constant dense<0.000000e+00> : vector<56x8xf32>
    %99 = tpu.matmul %96, %98, %cst_118 {dimension_numbers = #tpu.dot_dimension_numbers<[1], [0], [0], [1], [0, 0, 1, 1], [], []>} : vector<56x8xbf16>, vector<8x8xbf16>, vector<56x8xf32> -> vector<56x8xf32>
    %100 = arith.addf %95, %99 : vector<56x8xf32>
    %c50_119 = arith.constant 50 : index
    %c0_120 = arith.constant 0 : index
    %101 = vector.load %arg8[%c50_119, %c0_120] : memref<112x8xbf16, #tpu.memory_space<vmem>>, vector<56x8xbf16>
    %c0_121 = arith.constant 0 : index
    %c64_122 = arith.constant 64 : index
    %c0_123 = arith.constant 0 : index
    %102 = vector.load %arg6[%c0_121, %c64_122, %c0_123] : memref<1x72x8xbf16, #tpu.memory_space<vmem>>, vector<1x8x8xbf16>
    %103 = vector.shape_cast %102 : vector<1x8x8xbf16> to vector<8x8xbf16>
    %cst_124 = arith.constant dense<0.000000e+00> : vector<56x8xf32>
    %104 = tpu.matmul %101, %103, %cst_124 {dimension_numbers = #tpu.dot_dimension_numbers<[1], [0], [0], [1], [0, 0, 1, 1], [], []>} : vector<56x8xbf16>, vector<8x8xbf16>, vector<56x8xf32> -> vector<56x8xf32>
    %105 = arith.addf %100, %104 : vector<56x8xf32>
    %c0_125 = arith.constant 0 : index
    %c0_126 = arith.constant 0 : index
    %c88_127 = arith.constant 88 : index
    %c0_128 = arith.constant 0 : index
    %106 = vector.load %arg7[%c0_125, %c0_126, %c88_127, %c0_128] : memref<1x1x144x8xf32, #tpu.memory_space<vmem>>, vector<1x1x56x8xf32>
    %107 = vector.shape_cast %106 : vector<1x1x56x8xf32> to vector<56x8xf32>
    %108 = vector.shape_cast %105 : vector<56x8xf32> to vector<1x1x56x8xf32>
    tpu.vector_store %arg7[%c0_125, %c0_126, %c88_127, %c0_128], %108 {strides = array<i32>} : memref<1x1x144x8xf32, #tpu.memory_space<vmem>>, vector<1x1x56x8xf32>,
    return
  }
  func.func @transform_0(%arg0: i32, %arg1: i32, %arg2: i32, %arg3: i32) -> (i32, i32, i32, i32) {
    %c0_i32 = arith.constant 0 : i32
    %c0_i32_0 = arith.constant 0 : i32
    return %arg2, %arg0, %arg3, %c0_i32 : i32, i32, i32, i32
  }
  func.func @transform_1(%arg0: i32, %arg1: i32, %arg2: i32, %arg3: i32) -> (i32, i32, i32, i32) {
    %c0_i32 = arith.constant 0 : i32
    %c0_i32_0 = arith.constant 0 : i32
    return %arg2, %arg0, %arg3, %c0_i32 : i32, i32, i32, i32
  }
  func.func @transform_2(%arg0: i32, %arg1: i32, %arg2: i32, %arg3: i32) -> (i32, i32, i32) {
    %c0_i32 = arith.constant 0 : i32
    %c0_i32_0 = arith.constant 0 : i32
    return %arg0, %c0_i32, %arg1 : i32, i32, i32
  }
  func.func @transform_3(%arg0: i32, %arg1: i32, %arg2: i32, %arg3: i32) -> (i32, i32, i32, i32) {
    %c0_i32 = arith.constant 0 : i32
    return %arg0, %arg2, %arg3, %arg1 : i32, i32, i32, i32
  }
}

</mosaic_0001>

<bundles_post_ra>
// kernel: _lambda_.1
= control target key start
LH: loop header
LB: loop body
LE: loop exit
PB: predicated region body
PF: predicated region fallthrough
CT: control target
= control target key end

     0   :  { %s3709_s12 = smov 0   ;;  %s3711_s13 = smov 0   ;;  %s4327_s0 = inlined_call_operand.vmem [shape: bf16[2,1,432,8], index: 0, kind: input, shape index: {}]   ;;  %s4328_s1 = inlined_call_operand.vmem [shape: bf16[2,1,168,8], index: 1, kind: input, shape index: {}]   ;;  %s4329_s2 = inlined_call_operand.vmem [shape: bf16[1,72,8], index: 2, kind: input, shape index: {}]   ;;  %s4330_s3 = inlined_call_operand.vmem [shape: f32[1,2,432,8], index: 3, kind: output, shape index: {}]  }
   0x1   :  { %s3713_s14 = smov 0   ;;  %s3715_s15 = smov 0  }
   0x2   :  { %s3717_s16 = smov 0  }
   0x3 LB: > { %s28_s17 = sadd.s32 1, %s3679_s14  ;;  %s31_s18 = sadd.s32 1, %s3683_s15  ;;  %s3687_s16 = sphi %s3717_s16, %s13_s16   ;;  %s3683_s15 = sphi %s3715_s15, %s4335_s15   ;;  %s3679_s14 = sphi %s3713_s14, %s4334_s14   ;;  %s3675_s13 = sphi %s3711_s13, %s4333_s13   ;;  %s3671_s12 = sphi %s3709_s12, %s4332_s12  }
   0x4   : > { %p29_p0 = scmp.ge.s32.totalorder %s28_s17, 3  ;;  %p2924_p1 = scmp.ge.s32.totalorder %s3687_s16, 1 }
   0x5   : > { %p220_p2 = scmp.lt.s32.totalorder %s3687_s16, 7 }
   0x6   : > { %s4337_s17 = smov (%p29_p0, %s28_s17), 0  ;;  %s4339_s18 = smov (!%p29_p0, %s31_s18), %s3683_s15 }
   0x7   : > { %p221_p3 = pnand %p2924_p1, %p220_p2  ;;  %p33_p4 = scmp.ge.s32.totalorder %s4339_s18, 2 }
   0x8   : > { %v349_v0 = vld [vmem:[%s4329_s2] sm:$0xf] (!%p221_p3)  ;;  %vm449_vm0 = vcmask (!%p221_p3), 1043456   ;;  %s284_s21 = smul.u32 (!%p221_p3), 18, %s3671_s12  ;;  %p285_p5 = scmp.lt.s32.totalorder (!%p221_p3), %s3675_s13, 1  ;;  %vm430_vm1 = vcmask (!%p221_p3), 64512  }
   0x9   : > { %s4341_s18 = smov (%p33_p4, %s4339_s18), 0  ;;  %224 = sbr.rel (%p221_p3) target bundleno = 425 (0x1a9), region = 32 }
   0xa   : > { %3548 = vmatprep.subr.msk.bf16.mxu0 (!%p221_p3), %vm449_vm0, %v349_v0  ;;  %v3747_v1 = vsel (!%p221_p3), %vm449_vm0, %v349_v0, 0  ;;  %v351_v2 = vld [vmem:[%s4329_s2 + $0x4] sm:$0xf] (!%p221_p3)  ;;  %v631_v4 = vld [vmem:[%s4329_s2 + $0x8] sm:$0xf] (!%p221_p3)  ;;  %p289_p6 = scmp.lt.s32.totalorder (!%p221_p3), %s284_s21, 53 }
   0xb   : > { %3185 = vmatpush3.bf16.msra.mxu0 (!%p221_p3), %v3747_v1  ;;  %3547 = vmatprep.subr.msk.bf16.mxu1 (!%p221_p3), %vm449_vm0, %v351_v2  ;;  %v451_v3 = vsel (!%p221_p3), %vm449_vm0, %v351_v2, 0  ;;  %vm382_vm2 = vsmask.f32 (!%p221_p3), 7424  ;;  %s298_s5 = smul.u32 (!%p221_p3), 7, %s3671_s12  ;;  %vm635_vm3 = vcmask (!%p221_p3), 1046528   ;;  %v666_v13 = vsel (!%p221_p3), %vm449_vm0, %v631_v4, 0 }
   0xc   : > { %3171 = vmatpush3.bf16.msra.mxu1 (!%p221_p3), %v451_v3  ;;  %3550 = vmatprep.subr.msk.bf16.mxu0 (!%p221_p3), %vm449_vm0, %v631_v4  ;;  %v770_v11 = vld [vmem:[%s4329_s2 + $0xc] sm:$0xf] (!%p221_p3)  ;;  %v3814_v37 = vld [vmem:[%s4329_s2 + $0x4] sm:$0xf] (!%p221_p3)  ;;  %v923_v53 = vld [vmem:[%s4329_s2 + $0x10] sm:$0xf] (!%p221_p3) }
   0xd   : > { %3549 = vmatprep.subr.msk.bf16.mxu1 (!%p221_p3), %vm449_vm0, %v349_v0  ;;  %p3788_p7 = scmp.lt.s32.totalorder (!%p221_p3), %s298_s5, 20  ;;  %v818_v48 = vsel (!%p221_p3), %vm449_vm0, %v770_v11, 0  ;;  %vm1766_vm4 = vcmask (!%p221_p3), 60416   ;;  %vm1797_vm5 = vcmask (!%p221_p3), 64516   ;;  %vm2203_vm6 = vsmask.f32 (!%p221_p3), 3328 }
   0xe   : > { %vm2337_vm7 = vcmask (!%p221_p3), 1042432  }
  0x10   : > { %s4343_s13 = smov (!%p285_p5, %s3675_s13), 1  ;;  %s4345_s21 = smov (!%p289_p6, %s284_s21), 53 }
  0x11   : > { %s3566_s26 = smul.u32 54, %s4343_s13  ;;  %s4347_s5 = smov (!%p3788_p7, %s298_s5), 20 }
  0x12   : > { %s3567_s9 = smul.u32 21, %s4343_s13 }
  0x13   : > { %s3763_s27 = sadd.s32 %s3566_s26, %s4345_s21 }
  0x14   : > { %s2925_s28 = sshll.u32 %s3763_s27, 2  ;;  %s308_s12 = sadd.s32 %s3567_s9, %s4347_s5 }
  0x15   : > { %s3769_s4 = scalar_lea.vmem %s4327_s0, %s2925_s28  ;;  %s2926_s20 = sshll.u32 %s308_s12, 2 }
  0x16   : > { %v338_v5 = vld [vmem:[%s3769_s4] sm:$0xf]  ;;  %v339_v6 = vld [vmem:[%s3769_s4 + $0x4] sm:$0xf]  ;;  %v3610_v10 = vld [vmem:[%s3769_s4 + $0x8] sm:$0xff]   ;;  %s3852_s23 = scalar_lea.vmem %s4328_s1, %s2926_s20  ;;  %s2927_s28 = sshll.u32 %s3763_s27, 3 }
  0x17   : > { %v630_v7 = vld [vmem:[%s3769_s4] sm:$0xe]  ;;  %v2928_v8 = vcombine.low %v338_v5, %v339_v6  ;;  %v3780_v12 = vld [vmem:[%s3769_s4 + $0x10] sm:$0xff]   ;;  %v391_v17 = vshll.u32 %v3610_v10, 16  ;;  %v395_v18 = vshrl.u32 %v3610_v10, 16  ;;  %v637_v20 = vrot.slane %v3610_v10, 1  ;;  %s4274_s5 = scalar_lea.vmem %s4330_s3, %s2927_s28 }
  0x18   : > { %v2947_v9 = vcombine.low %v630_v7, %v339_v6  ;;  %v399_v19 = vshll.u32 %v3780_v12, 16  ;;  %v3793_v23 = vld [vmem:[%s3769_s4 + $0x18] sm:$0xff]   ;;  %v403_v24 = vshrl.u32 %v3780_v12, 16  ;;  %v3798_v27 = vld [vmem:[%s3769_s4 + $0x20] sm:$0xff]   ;;  %v3802_v28 = vld [vmem:[%s3769_s4 + $0x28] sm:$0xf] }
  0x19   : > { %3186 = vmatprep.mubr.msk.bf16.mxu0 %vm430_vm1, %v2928_v8  ;;  %v384_v15 = vshrl.u32 %v2928_v8, 16  ;;  %v386_v16 = vshll.u32 %v2928_v8, 16  ;;  %v393_v22 = vrot.slane %v391_v17, 1  ;;  %v407_v31 = vshll.u32 %v3793_v23, 16  ;;  %v350_v32 = vld [vmem:[%s3769_s4 + $0x2c] sm:$0x1] }
  0x1a   : > { %v636_v14 = vrot.slane %v2947_v9, 1  ;;  %3187 = vmatmul.mubr.msk.bf16.vlgmr.msra.gmra.mrb[0].mxu0 %vm430_vm1, %v3610_v10  ;;  %v401_v25 = vrot.slane %v399_v19, 1  ;;  %v639_v33 = vrot.slane %v3780_v12, 1  ;;  %v411_v35 = vshrl.u32 %v3793_v23, 16  ;;  %v3620_v49 = vld [vmem:[%s3769_s4 + $0x2c] sm:$0xff]   ;;  %v3621_v54 = vld [vmem:[%s3769_s4 + $0x34] sm:$0xff]  }
  0x1b   : > { %v388_v21 = vrot.slane %v386_v16, 1  ;;  %3199 = vmatpush3.bf16.msra.mxu0 %v666_v13  ;;  %v397_v30 = vor.u32 %v395_v18, %v393_v22  ;;  %v415_v36 = vshll.u32 %v3798_v27, 16  ;;  %v409_v40 = vrot.slane %v407_v31, 1  ;;  %1763 = vst.msk [vmem:[#allocation2] sm:$0xff] %vm430_vm1, %v3620_v49  ;;  %1764 = vst.msk [vmem:[#allocation2 + $0x8] sm:$0xff] %vm430_vm1, %v3621_v54  ;;  %v3622_v56 = vld [vmem:[%s3769_s4 + $0x3c] sm:$0xff]  }
  0x1c   : > { %v638_v26 = vsel %vm635_vm3, %v636_v14, %v637_v20  ;;  %3551 = vmatprep.subr.msk.bf16.mxu0 %vm449_vm0, %v770_v11  ;;  %v405_v34 = vor.u32 %v403_v24, %v401_v25  ;;  %v3823_v41 = vcombine.low %v3802_v28, %v350_v32  ;;  %v641_v42 = vrot.slane %v3793_v23, 1  ;;  %1765 = vst.msk [vmem:[#allocation2 + $0x10] sm:$0xff] %vm430_vm1, %v3622_v56  ;;  %v3625_v60 = vld [vmem:[%s3769_s4 + $0x44] ss:$0 sps:$4 sm:$0xff]   ;;  %v3626_v62 = vld [vmem:[%s3852_s23] ss:$0 sps:$4 sm:$0xff]  }
  0x1d   : > { %v389_v29 = vor.u32 %v388_v21, %v384_v15  ;;  %3200 = vmatprep.mubr.msk.bf16.mxu0 %vm430_vm1, %v638_v26  ;;  %v402_v39 = vsel %vm382_vm2, %v397_v30, %v401_v25  ;;  %v419_v43 = vshrl.u32 %v3798_v27, 16  ;;  %v417_v45 = vrot.slane %v415_v36, 1  ;;  %1767 = vst.msk [vmem:[#allocation2 + $0x18] sm:$0xf] %vm1766_vm4, %v3625_v60  ;;  %v3634_v4 = vld [vmem:[%s3852_s23 + $0x4] sm:$0xff]   ;;  %v3615_v6 = vld [vmem:[%s3769_s4 + $0xc] sm:$0xff]  }
  0x1e   : > { %v410_v44 = vsel %vm382_vm2, %v405_v34, %v409_v40  ;;  %v423_v46 = vshll.u32 %v3823_v41, 16  ;;  %v413_v47 = vor.u32 %v411_v35, %v409_v40  ;;  %v640_v50 = vsel %vm635_vm3, %v637_v20, %v639_v33  ;;  %1798 = vst.msk [vmem:[#allocation2 + $0x18] sm:$0xf0] %vm1797_vm5, %v3626_v62  ;;  %v912_v8 = vld [vmem:[%s3769_s4 + $0x10] sm:$0xf]  ;;  %v3886_v14 = vld [vmem:[%s3769_s4 + $0x14] sm:$0xff]  }
  0x1f   : > { %v394_v38 = vsel %vm382_vm2, %v389_v29, %v393_v22  ;;  %v421_v51 = vor.u32 %v419_v43, %v417_v45  ;;  %v642_v55 = vsel %vm635_vm3, %v639_v33, %v641_v42  ;;  %v643_v58 = vrot.slane %v3798_v27, 1  ;;  %1799 = vst.msk [vmem:[#allocation2 + $0x20] sm:$0xff] %vm430_vm1, %v3634_v4  ;;  %v1113_v9 = vld [vmem:[%s3769_s4 + $0xc] sm:$0xe]  ;;  %v3889_v15 = vld [vmem:[%s3769_s4 + $0x24] sm:$0xff]   ;;  %v3616_v20 = vld [vmem:[%s3769_s4 + $0x14] sm:$0xff]  }
  0x20   : > { %3172 = vmatprep.mubr.msk.bf16.mxu1 %vm430_vm1, %v394_v38  ;;  %v425_v52 = vrot.slane %v423_v46, 1  ;;  %v418_v57 = vsel %vm382_vm2, %v413_v47, %v417_v45  ;;  %v645_v61 = vrot.slane %v3823_v41, 1  ;;  %v427_v63 = vshrl.u32 %v3823_v41, 16  ;;  %v911_v13 = vld [vmem:[%s3769_s4 + $0xc] sm:$0xf]  ;;  %v3618_v32 = vld [vmem:[%s3769_s4 + $0x1c] sm:$0xff]  }
  0x21   : > { %3173 = vmatmul.mubr.msk.bf16.vlgmr.msra.gmra.mrb[0].mxu1 %vm430_vm1, %v402_v39  ;;  %v644_v0 = vsel %vm635_vm3, %v641_v42, %v643_v58  ;;  %v1853_v10 = vsel %vm449_vm0, %v3814_v37, 0  ;;  %v3895_v17 = vld [vmem:[%s3769_s4 + $0x2c] sm:$0xff]   ;;  %v2978_v18 = vcombine.low %v1113_v9, %v912_v8  ;;  %v1119_v19 = vrot.slane %v3886_v14, 1  ;;  %v1806_v22 = vld [vmem:[%s4329_s2] sm:$0xf]  ;;  %v3619_v47 = vld [vmem:[%s3769_s4 + $0x24] sm:$0xff]  }
  0x22   : > { %3387 = vmatpush3.bf16.msra.mxu1 %v3747_v1  ;;  %3176 = vmatprep.mubr.msk.bf16.mxu1 %vm430_vm1, %v410_v44  ;;  %v426_v59 = vsel %vm382_vm2, %v421_v51, %v425_v52  ;;  %v646_v1 = vsel %vm635_vm3, %v643_v58, %v645_v61  ;;  %v429_v2 = vor.u32 %v427_v63, %v425_v52  ;;  %v3868_v3 = vld [vmem:[#allocation2] sm:$0xff]  ;;  %v3877_v7 = vld [vmem:[#allocation2 + $0x8] sm:$0xff]  ;;  %v1020_v21 = vsel %vm449_vm0, %v923_v53, 0  ;;  %v3912_v31 = vld [vmem:[%s3769_s4 + $0x34] sm:$0x1f]  }
  0x23   : > { %3557 = vmatprep.subr.msk.bf16.mxu1 %vm449_vm0, %v3814_v37  ;;  %v1812_v5 = vshll.u32 %v3868_v3, 16  ;;  %v1810_v11 = vshrl.u32 %v3868_v3, 16  ;;  %v1817_v16 = vshll.u32 %v3877_v7, 16  ;;  %v3905_v24 = vld [vmem:[#allocation2 + $0x10] sm:$0xff]  ;;  %v1118_v25 = vrot.slane %v2978_v18, 1  ;;  %v3951_v46 = vld [vmem:[%s3769_s4 + $0x20] sm:$0xff]  }
  0x24   : > { %v1123_v26 = vrot.slane %v3889_v15, 1  ;;  %v1125_v29 = vrot.slane %v3895_v17, 1  ;;  %v2966_v30 = vcombine.low %v911_v13, %v912_v8  ;;  %v3639_v37 = vld [vmem:[%s3852_s23 + $0xc] sm:$0xff]   ;;  %v2940_v38 = vcombine.low %v3802_v28, %v3802_v28  ;;  %v3936_v40 = vld [vmem:[%s4329_s2 + $0x14] sm:$0xf] }
  0x25   : > { %v1819_v34 = vrot.slane %v1817_v16, 1  ;;  %v3926_v36 = vld [vmem:[#allocation2 + $0x18] sm:$0x1f]  ;;  %v1825_v39 = vshll.u32 %v3905_v24, 16  ;;  %v1821_v41 = vshrl.u32 %v3877_v7, 16  ;;  %1800 = vst.msk [vmem:[#allocation2 + $0x28] sm:$0xff] %vm430_vm1, %v3639_v37 }
  0x26   : > { %3201 = vmatmul.mubr.msk.bf16.vlgmr.msra.gmra.mrb[0].mxu0 %vm430_vm1, %v640_v50  ;;  %v3924_v35 = vsel %vm635_vm3, %v1123_v26, %v1125_v29  ;;  %v957_v42 = vshll.u32 %v2966_v30, 16  ;;  %v1829_v44 = vshrl.u32 %v3905_v24, 16  ;;  %v1833_v45 = vshll.u32 %v3926_v36, 16  ;;  %v3623_v50 = vld [vmem:[%s3769_s4 + $0x2c] sm:$0xff]   ;;  %v1393_v54 = vld [vmem:[%s3769_s4 + $0x18] sm:$0xf] }
  0x27   : > { %3204 = vmatprep.mubr.msk.bf16.mxu0 %vm430_vm1, %v642_v55  ;;  %3213 = vmatpush3.bf16.msra.mxu0 %v818_v48  ;;  %v1827_v48 = vrot.slane %v1825_v39, 1  ;;  %v1823_v49 = vor.u32 %v1821_v41, %v1819_v34  ;;  %v955_v51 = vshrl.u32 %v2966_v30, 16  ;;  %v1444_v58 = vshll.u32 %v3951_v46, 16  ;;  %v3973_v63 = vld [vmem:[%s3769_s4 + $0x28] sm:$0xff]   ;;  %v3624_v13 = vld [vmem:[%s3769_s4 + $0x34] ss:$0 sps:$4 sm:$0xff]  }
  0x28   : > { %3552 = vmatprep.subr.msk.bf16.mxu0 %vm449_vm0, %v923_v53  ;;  %v959_v52 = vrot.slane %v957_v42, 1  ;;  %v962_v53 = vshll.u32 %v3886_v14, 16  ;;  %v1835_v56 = vrot.slane %v1833_v45, 1  ;;  %v1929_v60 = vsel %vm449_vm0, %v1806_v22, 0  ;;  %v4009_v45 = vld [vmem:[%s3769_s4 + $0x40] sm:$0x1f]  }
  0x29   : > { %3177 = vmatmul.mubr.msk.bf16.gmra.mrb[4].mxu1 %vm430_vm1, %v418_v57  ;;  %v1831_v55 = vor.u32 %v1829_v44, %v1827_v48  ;;  %v3966_v57 = vld [vmem:[%s3769_s4 + $0x1c] sm:$0xf]  ;;  %v1448_v62 = vshrl.u32 %v3951_v46, 16  ;;  %v1456_v18 = vshrl.u32 %v3973_v63, 16 }
  0x2a   : > { %3180 = vmatprep.mubr.msk.bf16.mxu1 %vm430_vm1, %v426_v59  ;;  %v2997_v59 = vcombine.low %v1393_v54, %v3966_v57  ;;  %v964_v9 = vrot.slane %v962_v53, 1  ;;  %v1476_v54 = vshll.u32 %v4009_v45, 16 }
  0x2b   : > { %v1836_v8 = vsel %vm382_vm2, %v1831_v55, %v1835_v56  ;;  %v3648_v55 = vld [vmem:[%s3852_s23 + $0x14] sm:$0xff]  }
  0x2c   : > { %v1437_v4 = vshrl.u32 %v2997_v59, 16  ;;  %1801 = vst.msk [vmem:[#allocation2 + $0x30] sm:$0xff] %vm430_vm1, %v3648_v55  ;;  %v2006_v55 = vrot.slane %v3926_v36, 1 }
  0x2e   : > { %3205 = vmatmul.mubr.msk.bf16.gmra.mrb[4].mxu0 %vm430_vm1, %v644_v0  ;;  %v1828_v0 = vsel %vm382_vm2, %v1823_v49, %v1827_v48 }
  0x2f   : > { %3208 = vmatprep.mubr.msk.bf16.mxu0 %vm430_vm1, %v646_v1  ;;  %v3978_v1 = vld [vmem:[%s3769_s4 + $0x1c] sm:$0xff]  }
  0x31   : > { %3181 = vmatmul.mubr.msk.bf16.gmra.mrb[8].mxu1 %vm430_vm1, %v429_v2  ;;  %v3983_v2 = vld [vmem:[%s4329_s2 + $0x8] sm:$0xf] }
  0x32   : > { %3190 = vmatprep.mubr.msk.bf16.mxu1 %vm430_vm1, %v3780_v12  ;;  %v1814_v12 = vrot.slane %v1812_v5, 1  ;;  %v1439_v5 = vshll.u32 %v2997_v59, 16 }
  0x34   : > { %v1815_v33 = vor.u32 %v1814_v12, %v1810_v11  ;;  %v1452_v11 = vshll.u32 %v3973_v63, 16  ;;  %v960_v12 = vor.u32 %v959_v52, %v955_v51  ;;  %v1441_v16 = vrot.slane %v1439_v5, 1 }
  0x36   : > { %3209 = vmatmul.mubr.msk.bf16.gmra.mrb[8].mxu0 %vm430_vm1, %v645_v61  ;;  %v1820_v28 = vsel %vm382_vm2, %v1815_v33, %v1819_v34  ;;  %v1446_v61 = vrot.slane %v1444_v58, 1  ;;  %v974_v33 = vshrl.u32 %v3978_v1, 16  ;;  %v1442_v34 = vor.u32 %v1441_v16, %v1437_v4  ;;  %v1595_v58 = vld [vmem:[%s3769_s4 + $0x18] sm:$0xe] }
  0x37   : > { %3214 = vmatprep.mubr.msk.bf16.mxu0 %vm430_vm1, %v3615_v6  ;;  %v3986_v6 = vld [vmem:[%s3769_s4 + $0x30] sm:$0xff]   ;;  %v1601_v4 = vrot.slane %v3951_v46, 1  ;;  %v986_v46 = vshll.u32 %v3895_v17, 16 }
  0x38   : > { %v1464_v30 = vshrl.u32 %v3986_v6, 16  ;;  %v4013_v48 = vsel %vm382_vm2, %v1442_v34, %v1446_v61 }
  0x39   : > { %3191 = vmatmul.mubr.msk.bf16.vlgmr.msra.gmra.mrb[4].mxu1 %vm430_vm1, %v3793_v23  ;;  %v3919_v23 = vsel %vm635_vm3, %v1118_v25, %v1119_v19  ;;  %v1454_v25 = vrot.slane %v1452_v11, 1  ;;  %v1605_v11 = vrot.slane %v3986_v6, 1 }
  0x3a   : > { %3297 = vmatpush3.bf16.msra.mxu1 %v1853_v10  ;;  %3194 = vmatprep.mubr.msk.bf16.mxu1 %vm430_vm1, %v3798_v27  ;;  %v1127_v27 = vrot.slane %v3912_v31, 1  ;;  %v1450_v10 = vor.u32 %v1448_v62, %v1446_v61  ;;  %v3009_v62 = vcombine.low %v1595_v58, %v3966_v57 }
  0x3b   : > { %3558 = vmatprep.subr.msk.bf16.mxu1 %vm449_vm0, %v1806_v22  ;;  %v966_v22 = vshrl.u32 %v3886_v14, 16  ;;  %v1458_v42 = vor.u32 %v1456_v18, %v1454_v25 }
  0x3c   : > { %v3943_v43 = vsel %vm635_vm3, %v1125_v29, %v1127_v27  ;;  %v3646_v29 = vld [vmem:[%s3769_s4 + $0x38] sm:$0xff]   ;;  %v4006_v41 = vsel %vm382_vm2, %v1450_v10, %v1454_v25  ;;  %v1600_v10 = vrot.slane %v3009_v62, 1  ;;  %v994_v25 = vshll.u32 %v3912_v31, 16 }
  0x3d   : > { %v968_v59 = vor.u32 %v966_v22, %v964_v9  ;;  %v990_v22 = vshrl.u32 %v3895_v17, 16  ;;  %v2021_v17 = vsel %vm449_vm0, %v3983_v2, 0 }
  0x3e   : > { %3215 = vmatmul.mubr.msk.bf16.vlgmr.msra.gmra.mrb[0].mxu0 %vm430_vm1, %v3616_v20  ;;  %v1460_v20 = vshll.u32 %v3986_v6, 16  ;;  %v1609_v6 = vrot.slane %v4009_v45, 1 }
  0x3f   : > { %3218 = vmatprep.mubr.msk.bf16.mxu0 %vm430_vm1, %v3618_v32  ;;  %3227 = vmatpush3.bf16.msra.mxu0 %v1020_v21  ;;  %v1837_v21 = vshrl.u32 %v3926_v36, 16  ;;  %v970_v32 = vshll.u32 %v3978_v1, 16 }
  0x40   : > { %3553 = vmatprep.subr.msk.bf16.mxu0 %vm449_vm0, %v3936_v40  ;;  %v1462_v37 = vrot.slane %v1460_v20, 1  ;;  %v1607_v20 = vrot.slane %v3646_v29, 1 }
  0x41   : > { %3195 = vmatmul.mubr.msk.bf16.gmra.mrb[8].mxu1 %vm430_vm1, %v2940_v38  ;;  %v978_v38 = vshll.u32 %v3889_v15, 16  ;;  %v1839_v51 = vor.u32 %v1837_v21, %v1835_v56  ;;  %v1148_v21 = vsel %vm449_vm0, %v3936_v40, 0 }
  0x42   : > { %3298 = vmatprep.mubr.msk.bf16.mxu1 %vm430_vm1, %v1820_v28  ;;  %v1468_v28 = vshll.u32 %v3646_v29, 16  ;;  %v1466_v49 = vor.u32 %v1464_v30, %v1462_v37  ;;  %v4016_v52 = vsel %vm382_vm2, %v1458_v42, %v1462_v37  ;;  %v1252_v30 = vld [vmem:[%s4329_s2 + $0x18] sm:$0xf]  ;;  %v996_v37 = vrot.slane %v994_v25, 1  ;;  %v2098_v42 = vld [vmem:[%s4329_s2 + $0xc] sm:$0xf] }
  0x44   : > { %v1470_v53 = vrot.slane %v1468_v28, 1 }
  0x46   : > { %3219 = vmatmul.mubr.msk.bf16.gmra.mrb[4].mxu0 %vm430_vm1, %v3619_v47  ;;  %v965_v47 = vsel %vm382_vm2, %v960_v12, %v964_v9  ;;  %v4025_v61 = vsel %vm382_vm2, %v1466_v49, %v1470_v53  ;;  %v1603_v9 = vrot.slane %v3973_v63, 1  ;;  %v4043_v12 = vsel %vm635_vm3, %v1600_v10, %v1601_v4  ;;  %v1405_v10 = vld [vmem:[%s4329_s2 + $0x1c] sm:$0xf] }
  0x47   : > { %3222 = vmatprep.mubr.msk.bf16.mxu0 %vm430_vm1, %v3623_v50  ;;  %v1472_v50 = vshrl.u32 %v3646_v29, 16  ;;  %v4067_v29 = vsel %vm635_vm3, %v1607_v20, %v1609_v6 }
  0x48   : > { %v4046_v63 = vsel %vm635_vm3, %v1601_v4, %v1603_v9  ;;  %v4050_v18 = vsel %vm635_vm3, %v1603_v9, %v1605_v11  ;;  %v2202_v4 = vld [vmem:[%s4329_s2 + $0x10] sm:$0xf]  ;;  %v4122_v9 = vld [vmem:[#allocation2 + $0x20] sm:$0xff] }
  0x49   : > { %3299 = vmatmul.mubr.msk.bf16.vlgmr.msra.gmra.mrb[12].mxu1 %vm430_vm1, %v1828_v0  ;;  %v1474_v56 = vor.u32 %v1472_v50, %v1470_v53  ;;  %v4027_v0 = vrot.slane %v1476_v54, 1  ;;  %v1805_v50 = vld [vmem:[#allocation2 + $0x18] sm:$0xf] }
  0x4a   : > { %3307 = vmatpush3.bf16.msra.mxu1 %v1929_v60  ;;  %3302 = vmatprep.mubr.msk.bf16.mxu1 %vm430_vm1, %v1836_v8  ;;  %v972_v60 = vrot.slane %v970_v32, 1  ;;  %v980_v8 = vrot.slane %v978_v38, 1  ;;  %v4062_v32 = vsel %vm635_vm3, %v1605_v11, %v1607_v20  ;;  %v1995_v38 = vld [vmem:[#allocation2] sm:$0xfe]  ;;  %v2109_v11 = vrot.slane %v4122_v9, 4 }
  0x4b   : > { %3559 = vmatprep.subr.msk.bf16.mxu1 %vm449_vm0, %v3983_v2  ;;  %v4035_v57 = vsel %vm382_vm2, %v1474_v56, %v4027_v0  ;;  %v2001_v28 = vrot.slane %v1995_v38, 1  ;;  %v2094_v56 = vld [vmem:[#allocation2 + $0x8] sm:$0xf0]  ;;  %v2257_v20 = vsel %vm449_vm0, %v2202_v4, 0 }
  0x4c   : > { %v976_v5 = vor.u32 %v974_v33, %v972_v60  ;;  %v973_v16 = vsel %vm382_vm2, %v968_v59, %v972_v60  ;;  %v988_v33 = vrot.slane %v986_v46, 1  ;;  %v2124_v59 = vsel %vm449_vm0, %v2098_v42, 0 }
  0x4d   : > { %v1121_v60 = vrot.slane %v3978_v1, 1 }
  0x4e   : > { %3223 = vmatmul.mubr.msk.bf16.gmra.mrb[8].mxu0 %vm430_vm1, %v3624_v13  ;;  %v982_v13 = vshrl.u32 %v3889_v15, 16  ;;  %v992_v34 = vor.u32 %v990_v22, %v988_v33  ;;  %v2197_v15 = vld [vmem:[#allocation2 + $0x8] sm:$0xf0] }
  0x4f   : > { %3228 = vmatprep.mubr.msk.bf16.mxu0 %vm430_vm1, %v965_v47  ;;  %v2002_v47 = vrot.slane %v3877_v7, 1  ;;  %v1122_v36 = vsel %vm635_vm3, %v1119_v19, %v1121_v60  ;;  %v1124_v1 = vsel %vm635_vm3, %v1121_v60, %v1123_v26  ;;  %v4120_v19 = vld [vmem:[#allocation2 + $0x18] sm:$0xff]  ;;  %v2208_v46 = vshll.u32 %v2197_v15, 16 }
  0x50   : > { %v984_v40 = vor.u32 %v982_v13, %v980_v8  ;;  %v997_v49 = vsel %vm382_vm2, %v992_v34, %v996_v37  ;;  %v2107_v26 = vrot.slane %v4120_v19, 4  ;;  %v2205_v13 = vshrl.u32 %v2197_v15, 16  ;;  %v2437_v60 = vld [vmem:[%s4329_s2 + $0x18] sm:$0xf] }
  0x51   : > { %3303 = vmatmul.mubr.msk.bf16.gmra.mrb[16].mxu1 %vm430_vm1, %v1839_v51  ;;  %v998_v51 = vshrl.u32 %v3912_v31, 16  ;;  %v2003_v53 = vsel %vm635_vm3, %v2001_v28, %v2002_v47  ;;  %v2210_v25 = vrot.slane %v2208_v46, 5  ;;  %v2234_v34 = vshll.u32 %v4122_v9, 16  ;;  %v3636_v31 = vld [vmem:[%s3769_s4 + $0x20] sm:$0xff]  }
  0x52   : > { %3308 = vmatprep.mubr.msk.bf16.mxu1 %vm430_vm1, %v3868_v3  ;;  %v981_v3 = vsel %vm382_vm2, %v976_v5, %v980_v8  ;;  %v989_v2 = vsel %vm382_vm2, %v984_v40, %v988_v33  ;;  %v2104_v5 = vrot.slane %v2094_v56, 4  ;;  %v1300_v8 = vsel %vm449_vm0, %v1252_v30, 0  ;;  %v3635_v33 = vld [vmem:[%s3769_s4 + $0x18] sm:$0xff]  }
  0x53   : > { %v1000_v54 = vor.u32 %v998_v51, %v996_v37  ;;  %v2207_v22 = vrot.slane %v2205_v13, 4  ;;  %v2236_v28 = vrot.slane %v2234_v34, 5  ;;  %v1502_v51 = vsel %vm449_vm0, %v1405_v10, 0 }
  0x54   : > { %v2451_v15 = vsel %vm449_vm0, %v2437_v60, 0 }
  0x56   : > { %3229 = vmatmul.mubr.msk.bf16.vlgmr.msra.gmra.mrb[0].mxu0 %vm430_vm1, %v973_v16 }
  0x57   : > { %3232 = vmatprep.mubr.msk.bf16.mxu0 %vm430_vm1, %v981_v3  ;;  %3241 = vmatpush3.bf16.msra.mxu0 %v1148_v21  ;;  %v2215_v3 = vrot.slane %v1829_v44, 4  ;;  %v2110_v21 = vsel %vm449_vm0, %v2107_v26, %v2109_v11  ;;  %v2222_v44 = vshrl.u32 %v4120_v19, 16 }
  0x58   : > { %3554 = vmatprep.subr.msk.bf16.mxu0 %vm449_vm0, %v1252_v30  ;;  %v2218_v30 = vrot.slane %v1825_v39, 5  ;;  %v2231_v39 = vshrl.u32 %v4122_v9, 16 }
  0x59   : > { %3309 = vmatmul.mubr.msk.bf16.vlgmr.msra.gmra.mrb[12].mxu1 %vm430_vm1, %v3877_v7  ;;  %v2004_v7 = vrot.slane %v3905_v24, 1  ;;  %v2224_v37 = vrot.slane %v2222_v44, 4 }
  0x5a   : > { %3317 = vmatpush3.bf16.msra.mxu1 %v2021_v17  ;;  %3312 = vmatprep.mubr.msk.bf16.mxu1 %vm430_vm1, %v3905_v24  ;;  %v2211_v17 = vor.u32 %v2210_v25, %v2207_v22  ;;  %v2219_v40 = vor.u32 %v2218_v30, %v2215_v3  ;;  %v2641_v3 = vld [vmem:[%s4329_s2 + $0x20] sm:$0xf]  ;;  %v2534_v22 = vrot.slane %v2234_v34, 1  ;;  %v2436_v30 = vld [vmem:[#allocation2 + $0x30] sm:$0xf] }
  0x5b   : > { %3560 = vmatprep.subr.msk.bf16.mxu1 %vm449_vm0, %v2098_v42  ;;  %v2005_v58 = vsel %vm635_vm3, %v2002_v47, %v2004_v7  ;;  %v2007_v62 = vsel %vm635_vm3, %v2004_v7, %v2006_v55  ;;  %v3637_v47 = vld [vmem:[%s3769_s4 + $0x28] sm:$0xff]  }
  0x5c   : > { %v2220_v42 = vsel %vm2203_vm6, %v2211_v17, %v2219_v40 }
  0x5e   : > { %3233 = vmatmul.mubr.msk.bf16.gmra.mrb[4].mxu0 %vm430_vm1, %v989_v2  ;;  %v2233_v2 = vrot.slane %v2231_v39, 4 }
  0x5f   : > { %3236 = vmatprep.mubr.msk.bf16.mxu0 %vm430_vm1, %v997_v49 }
  0x60   : > { %v2237_v49 = vor.u32 %v2236_v28, %v2233_v2 }
  0x61   : > { %3313 = vmatmul.mubr.msk.bf16.gmra.mrb[16].mxu1 %vm430_vm1, %v1805_v50  ;;  %v2201_v50 = vld [vmem:[#allocation2 + $0x28] sm:$0x1] }
  0x62   : > { %3318 = vmatprep.mubr.msk.bf16.mxu1 %vm430_vm1, %v2003_v53  ;;  %v1596_v53 = vld [vmem:[%s4329_s2 + $0x20] sm:$0xf]  ;;  %v2240_v7 = vshll.u32 %v2201_v50, 16  ;;  %v2345_v13 = vrot.slane %v2201_v50, 5 }
  0x63   : > { %v1630_v46 = vsel %vm449_vm0, %v1596_v53, 0 }
  0x64   : > { %v2242_v56 = vrot.slane %v2240_v7, 5 }
  0x66   : > { %3237 = vmatmul.mubr.msk.bf16.gmra.mrb[8].mxu0 %vm430_vm1, %v1000_v54 }
  0x67   : > { %3242 = vmatprep.mubr.msk.bf16.mxu0 %vm430_vm1, %v3919_v23  ;;  %v2105_v23 = vrot.slane %v3905_v24, 4 }
  0x69   : > { %3319 = vmatmul.mubr.msk.bf16.vlgmr.msra.gmra.mrb[12].mxu1 %vm430_vm1, %v2005_v58  ;;  %v2106_v14 = vsel %vm449_vm0, %v2104_v5, %v2105_v23  ;;  %v2108_v16 = vsel %vm449_vm0, %v2105_v23, %v2107_v26  ;;  %v2339_v5 = vrot.slane %v3905_v24, 5  ;;  %v2243_v23 = vsel %vm2203_vm6, %v2237_v49, %v2242_v56 }
  0x6a   : > { %3327 = vmatpush3.bf16.msra.mxu1 %v2124_v59  ;;  %3322 = vmatprep.mubr.msk.bf16.mxu1 %vm430_vm1, %v2007_v62  ;;  %v2330_v59 = vld [vmem:[#allocation2 + $0x8] sm:$0xe0]  ;;  %v3638_v62 = vld [vmem:[%s3769_s4 + $0x30] sm:$0xff]   ;;  %v2343_v24 = vrot.slane %v4122_v9, 5 }
  0x6b   : > { %3561 = vmatprep.subr.msk.bf16.mxu1 %vm449_vm0, %v2202_v4  ;;  %v3640_v4 = vld [vmem:[%s3769_s4 + $0x38] sm:$0xff]  }
  0x6e   : > { %3243 = vmatmul.mubr.msk.bf16.vlgmr.msra.gmra.mrb[0].mxu0 %vm430_vm1, %v1122_v36  ;;  %v2338_v36 = vrot.slane %v2330_v59, 5 }
  0x6f   : > { %3246 = vmatprep.mubr.msk.bf16.mxu0 %vm430_vm1, %v1124_v1  ;;  %3255 = vmatpush3.bf16.msra.mxu0 %v1300_v8  ;;  %v3641_v8 = vld [vmem:[%s3769_s4 + $0x40] ss:$0 sps:$4 sm:$0xff]  }
  0x70   : > { %3555 = vmatprep.subr.msk.bf16.mxu0 %vm449_vm0, %v1405_v10  ;;  %v2340_v1 = vsel %vm2337_vm7, %v2338_v36, %v2339_v5  ;;  %v2341_v10 = vrot.slane %v4120_v19, 5 }
  0x71   : > { %3323 = vmatmul.mubr.msk.bf16.gmra.mrb[16].mxu1 %vm430_vm1, %v2006_v55 }
  0x72   : > { %3328 = vmatprep.mubr.msk.bf16.mxu1 %vm430_vm1, %v2106_v14  ;;  %v2342_v14 = vsel %vm2337_vm7, %v2339_v5, %v2341_v10  ;;  %v2344_v26 = vsel %vm2337_vm7, %v2341_v10, %v2343_v24 }
  0x76   : > { %3247 = vmatmul.mubr.msk.bf16.gmra.mrb[4].mxu0 %vm430_vm1, %v3924_v35  ;;  %v2331_v35 = vld [vmem:[%s4329_s2 + $0x14] sm:$0xf] }
  0x77   : > { %3250 = vmatprep.mubr.msk.bf16.mxu0 %vm430_vm1, %v3943_v43  ;;  %v2225_v43 = vshll.u32 %v4120_v19, 16  ;;  %v2360_v55 = vsel %vm449_vm0, %v2331_v35, 0 }
  0x79   : > { %3329 = vmatmul.mubr.msk.bf16.vlgmr.msra.gmra.mrb[12].mxu1 %vm430_vm1, %v2108_v16  ;;  %v2227_v38 = vrot.slane %v2225_v43, 5  ;;  %v1480_v16 = vshrl.u32 %v4009_v45, 16 }
  0x7a   : > { %3337 = vmatpush3.bf16.msra.mxu1 %v2257_v20  ;;  %3332 = vmatprep.mubr.msk.bf16.mxu1 %vm430_vm1, %v2110_v21  ;;  %v2530_v20 = vrot.slane %v2225_v43, 1 }
  0x7b   : > { %3562 = vmatprep.subr.msk.bf16.mxu1 %vm449_vm0, %v2331_v35 }
  0x7c   : > { %v2531_v21 = vor.u32 %v2530_v20, %v2222_v44 }
  0x7e   : > { %3251 = vmatmul.mubr.msk.bf16.gmra.mrb[8].mxu0 %vm430_vm1, %v1127_v27  ;;  %v2228_v27 = vor.u32 %v2227_v38, %v2224_v37  ;;  %v2640_v37 = vld [vmem:[#allocation2 + $0x18] sm:$0xfe] }
  0x7f   : > { %3256 = vmatprep.mubr.msk.bf16.mxu0 %vm430_vm1, %v3635_v33  ;;  %v2646_v38 = vrot.slane %v2640_v37, 1 }
  0x80   : > { %v2229_v54 = vsel %vm2203_vm6, %v2219_v40, %v2228_v27  ;;  %v2238_v58 = vsel %vm2203_vm6, %v2228_v27, %v2237_v49 }
  0x81   : > { %3333 = vmatmul.mubr.msk.bf16.gmra.mrb[16].mxu1 %vm430_vm1, %v2109_v11  ;;  %v2525_v11 = vld [vmem:[%s4329_s2 + $0x1c] sm:$0xf] }
  0x82   : > { %3338 = vmatprep.mubr.msk.bf16.mxu1 %vm430_vm1, %v2220_v42  ;;  %v2647_v42 = vrot.slane %v4122_v9, 1 }
  0x86   : > { %3257 = vmatmul.mubr.msk.bf16.vlgmr.msra.gmra.mrb[0].mxu0 %vm430_vm1, %v3636_v31 }
  0x87   : > { %3260 = vmatprep.mubr.msk.bf16.mxu0 %vm430_vm1, %v3637_v47  ;;  %3269 = vmatpush3.bf16.msra.mxu0 %v1502_v51 }
  0x88   : > { %3556 = vmatprep.subr.msk.bf16.mxu0 %vm449_vm0, %v1596_v53 }
  0x89   : > { %3339 = vmatmul.mubr.msk.bf16.vlgmr.msra.gmra.mrb[12].mxu1 %vm430_vm1, %v2229_v54 }
  0x8a   : > { %3347 = vmatpush3.bf16.msra.mxu1 %v2360_v55  ;;  %3342 = vmatprep.mubr.msk.bf16.mxu1 %vm430_vm1, %v2238_v58 }
  0x8b   : > { %3563 = vmatprep.subr.msk.bf16.mxu1 %vm449_vm0, %v2437_v60 }
  0x8e   : > { %3261 = vmatmul.mubr.msk.bf16.gmra.mrb[4].mxu0 %vm430_vm1, %v3638_v62 }
  0x8f   : > { %3264 = vmatprep.mubr.msk.bf16.mxu0 %vm430_vm1, %v3640_v4 }
  0x91   : > { %3343 = vmatmul.mubr.msk.bf16.gmra.mrb[16].mxu1 %vm430_vm1, %v2243_v23 }
  0x92   : > { %3348 = vmatprep.mubr.msk.bf16.mxu1 %vm430_vm1, %v2340_v1 }
  0x96   : > { %3265 = vmatmul.mubr.msk.bf16.gmra.mrb[8].mxu0 %vm430_vm1, %v3641_v8 }
  0x97   : > { %3270 = vmatprep.mubr.msk.bf16.mxu0 %vm430_vm1, %v4013_v48  ;;  %v2346_v48 = vsel %vm2337_vm7, %v2343_v24, %v2345_v13 }
  0x99   : > { %3349 = vmatmul.mubr.msk.bf16.vlgmr.msra.gmra.mrb[12].mxu1 %vm430_vm1, %v2342_v14 }
  0x9a   : > { %3357 = vmatpush3.bf16.msra.mxu1 %v2451_v15  ;;  %3352 = vmatprep.mubr.msk.bf16.mxu1 %vm430_vm1, %v2344_v26 }
  0x9b   : > { %3564 = vmatprep.subr.msk.bf16.mxu1 %vm449_vm0, %v2525_v11 }
  0x9e   : > { %3271 = vmatmul.mubr.msk.bf16.vlgmr.msra.gmra.mrb[0].mxu0 %vm430_vm1, %v4006_v41  ;;  %v2567_v41 = vsel %vm449_vm0, %v2525_v11, 0 }
  0x9f   : > { %3274 = vmatprep.mubr.msk.bf16.mxu0 %vm430_vm1, %v4016_v52  ;;  %3283 = vmatpush3.bf16.msra.mxu0 %v1630_v46  ;;  %v2435_v52 = vld [vmem:[#allocation2 + $0x28] sm:$0xff] }
  0xa0   : > { %v2539_v25 = vshll.u32 %v2435_v52, 16  ;;  %v2543_v35 = vshrl.u32 %v2435_v52, 16  ;;  %v2649_v2 = vrot.slane %v2435_v52, 1 }
  0xa1   : > { %3353 = vmatmul.mubr.msk.bf16.gmra.mrb[16].mxu1 %vm430_vm1, %v2346_v48 }
  0xa2   : > { %3358 = vmatprep.mubr.msk.bf16.mxu1 %vm430_vm1, %v4120_v19  ;;  %v2541_v33 = vrot.slane %v2539_v25, 1  ;;  %v2538_v19 = vor.u32 %v2534_v22, %v2231_v39 }
  0xa4   : > { %v2545_v44 = vor.u32 %v2543_v35, %v2541_v33  ;;  %v2542_v40 = vsel %vm382_vm2, %v2538_v19, %v2541_v33 }
  0xa6   : > { %3275 = vmatmul.mubr.msk.bf16.gmra.mrb[4].mxu0 %vm430_vm1, %v4025_v61  ;;  %v1482_v61 = vor.u32 %v1480_v16, %v4027_v0  ;;  %v2535_v0 = vsel %vm382_vm2, %v2531_v21, %v2534_v22 }
  0xa7   : > { %3278 = vmatprep.mubr.msk.bf16.mxu0 %vm430_vm1, %v4035_v57  ;;  %v2524_v57 = vld [vmem:[#allocation2 + $0x30] sm:$0x1f] }
  0xa8   : > { %v2547_v43 = vshll.u32 %v2524_v57, 16  ;;  %v2551_v39 = vshrl.u32 %v2524_v57, 16  ;;  %v2651_v28 = vrot.slane %v2524_v57, 1 }
  0xa9   : > { %3359 = vmatmul.mubr.msk.bf16.vlgmr.msra.gmra.mrb[12].mxu1 %vm430_vm1, %v4122_v9  ;;  %v2650_v9 = vsel %vm635_vm3, %v2647_v42, %v2649_v2 }
  0xaa   : > { %3367 = vmatpush3.bf16.msra.mxu1 %v2567_v41  ;;  %3362 = vmatprep.mubr.msk.bf16.mxu1 %vm430_vm1, %v2435_v52  ;;  %v2549_v17 = vrot.slane %v2547_v43, 1  ;;  %v2652_v31 = vsel %vm635_vm3, %v2649_v2, %v2651_v28 }
  0xab   : > { %3565 = vmatprep.subr.msk.bf16.mxu1 %vm449_vm0, %v2641_v3 }
  0xac   : > { %v2550_v34 = vsel %vm382_vm2, %v2545_v44, %v2549_v17 }
  0xae   : > { %3279 = vmatmul.mubr.msk.bf16.gmra.mrb[8].mxu0 %vm430_vm1, %v1482_v61 }
  0xaf   : > { %3284 = vmatprep.mubr.msk.bf16.mxu0 %vm430_vm1, %v4043_v12  ;;  %v2666_v12 = vsel %vm449_vm0, %v2641_v3, 0 }
  0xb1   : > { %3363 = vmatmul.mubr.msk.bf16.gmra.mrb[16].mxu1 %vm430_vm1, %v2436_v30 }
  0xb2   : > { %3368 = vmatprep.mubr.msk.bf16.mxu1 %vm430_vm1, %v2535_v0 }
  0xb6   : > { %3285 = vmatmul.mubr.msk.bf16.vlgmr.msra.gmra.mrb[0].mxu0 %vm430_vm1, %v4046_v63  ;;  %v2553_v63 = vor.u32 %v2551_v39, %v2549_v17 }
  0xb7   : > { %3288 = vmatprep.mubr.msk.bf16.mxu0 %vm430_vm1, %v4050_v18  ;;  %v2648_v18 = vsel %vm635_vm3, %v2646_v38, %v2647_v42 }
  0xb9   : > { %3369 = vmatmul.mubr.msk.bf16.vlgmr.msra.gmra.mrb[12].mxu1 %vm430_vm1, %v2542_v40 }
  0xba   : > { %3377 = vmatpush3.bf16.msra.mxu1 %v2666_v12  ;;  %3372 = vmatprep.mubr.msk.bf16.mxu1 %vm430_vm1, %v2550_v34 }
  0xbe   : > { %3289 = vmatmul.mubr.msk.bf16.gmra.mrb[4].mxu0 %vm430_vm1, %v4062_v32 }
  0xbf   : > { %3292 = vmatprep.mubr.msk.bf16.mxu0 %vm430_vm1, %v4067_v29 }
  0xc1   : > { %3373 = vmatmul.mubr.msk.bf16.gmra.mrb[16].mxu1 %vm430_vm1, %v2553_v63 }
  0xc2   : > { %3378 = vmatprep.mubr.msk.bf16.mxu1 %vm430_vm1, %v2648_v18 }
  0xc6   : > { %3293 = vmatmul.mubr.msk.bf16.gmra.mrb[8].mxu0 %vm430_vm1, %v1609_v6 }
  0xc9   : > { %3379 = vmatmul.mubr.msk.bf16.vlgmr.msra.gmra.mrb[12].mxu1 %vm430_vm1, %v2650_v9 }
  0xca   : > { %3382 = vmatprep.mubr.msk.bf16.mxu1 %vm430_vm1, %v2652_v31 }
  0xd1   : > { %3383 = vmatmul.mubr.msk.bf16.gmra.mrb[16].mxu1 %vm430_vm1, %v2651_v28 }
  0xf4   : > { %v3174_v32 = vpop.f32.mrb[0].mxu1 }
  0xf5   : > { %v487_v29 = vpop.f32.mrb[1].mxu1 }
  0xf6   : > { %v3175_v27 = vpop.f32.mrb[2].mxu1 }
  0xf7   : > { %v490_v47 = vpop.f32.mrb[3].mxu1 }
 0x10c   : > { %v3192_v49 = vpop.f32.mrb[4].mxu1 }
 0x10d   : > { %v600_v50 = vpop.f32.mrb[5].mxu1 }
 0x10e   : > { %v3193_v45 = vpop.f32.mrb[6].mxu1 }
 0x10f   : > { %v603_v51 = vpop.f32.mrb[7].mxu1 }
 0x114   : > { %v3196_v6 = vpop.f32.mrb[8].mxu1 }
 0x115   : > { %v616_v53 = vpop.f32.mrb[9].mxu1 }
 0x116   : > { %v3197_v54 = vpop.f32.mrb[10].mxu1 }
 0x117   : > { %v619_v7 = vpop.f32.mrb[11].mxu1 }
 0x189   : > { %v3286_v55 = vpop.f32.mrb[0].mxu0 }
 0x18a   : > { %v3388_v58 = vadd.f32 %v3286_v55, %v3174_v32  ;;  %v1666_v59 = vpop.f32.mrb[1].mxu0 }
 0x18b   : > { %v3389_v60 = vadd.f32 %v1666_v59, %v487_v29  ;;  %v3287_v62 = vpop.f32.mrb[2].mxu0 }
 0x18c   : > { %1725 = vst.msk [vmem:[%s4274_s5 + $0x10] sm:$0xff] %vm430_vm1, %v3388_v58  ;;  %v3390_v56 = vadd.f32 %v3287_v62, %v3175_v27  ;;  %v1669_v4 = vpop.f32.mrb[3].mxu0 }
 0x18d   : > { %1723 = vst.msk [vmem:[%s4274_s5] sm:$0xff] %vm430_vm1, %v3389_v60  ;;  %v3391_v36 = vadd.f32 %v1669_v4, %v490_v47 }
 0x18e   : > { %1726 = vst.msk [vmem:[%s4274_s5 + $0x18] sm:$0xff] %vm430_vm1, %v3390_v56 }
 0x18f   : > { %1724 = vst.msk [vmem:[%s4274_s5 + $0x8] sm:$0xff] %vm430_vm1, %v3391_v36 }
 0x191   : > { %v3290_v5 = vpop.f32.mrb[4].mxu0 }
 0x192   : > { %v3392_v23 = vadd.f32 %v3290_v5, %v3192_v49  ;;  %v1682_v1 = vpop.f32.mrb[5].mxu0 }
 0x193   : > { %v3393_v8 = vadd.f32 %v1682_v1, %v600_v50  ;;  %v3291_v10 = vpop.f32.mrb[6].mxu0 }
 0x194   : > { %1729 = vst.msk [vmem:[%s4274_s5 + $0x30] sm:$0xff] %vm430_vm1, %v3392_v23  ;;  %v3394_v24 = vadd.f32 %v3291_v10, %v3193_v45  ;;  %v1685_v14 = vpop.f32.mrb[7].mxu0 }
 0x195   : > { %1727 = vst.msk [vmem:[%s4274_s5 + $0x20] sm:$0xff] %vm430_vm1, %v3393_v8  ;;  %v3395_v15 = vadd.f32 %v1685_v14, %v603_v51 }
 0x196   : > { %1730 = vst.msk [vmem:[%s4274_s5 + $0x38] sm:$0xff] %vm430_vm1, %v3394_v24 }
 0x197   : > { %1728 = vst.msk [vmem:[%s4274_s5 + $0x28] sm:$0xff] %vm430_vm1, %v3395_v15 }
 0x199   : > { %v3294_v26 = vpop.f32.mrb[8].mxu0 }
 0x19a   : > { %v3396_v11 = vadd.f32 %v3294_v26, %v3196_v6  ;;  %v1698_v13 = vpop.f32.mrb[9].mxu0 }
 0x19b   : > { %v3397_v46 = vadd.f32 %v1698_v13, %v616_v53  ;;  %v3295_v48 = vpop.f32.mrb[10].mxu0 }
 0x19c   : > { %1733 = vst.msk [vmem:[%s4274_s5 + $0x50] sm:$0xff] %vm430_vm1, %v3396_v11  ;;  %v1701_v16 = vpop.f32.mrb[11].mxu0  ;;  %v3380_v20 = vpop.f32.mrb[12].mxu1 }
 0x19d   : > { %1731 = vst.msk [vmem:[%s4274_s5 + $0x40] sm:$0xff] %vm430_vm1, %v3397_v46  ;;  %v3398_v41 = vadd.f32 %v1701_v16, %v619_v7  ;;  %2741 = vst.msk [vmem:[%s4274_s5 + $0x68] sm:$0xff] %vm430_vm1, %v3380_v20  ;;  %v2702_v52 = vpop.f32.mrb[13].mxu1 }
 0x19e   : > { %2739 = vst.msk [vmem:[%s4274_s5 + $0x58] sm:$0xff] %vm430_vm1, %v2702_v52  ;;  %v3381_v3 = vpop.f32.mrb[14].mxu1 }
 0x19f   : > { %1732 = vst.msk [vmem:[%s4274_s5 + $0x48] sm:$0xff] %vm430_vm1, %v3398_v41  ;;  %2742 = vst.msk [vmem:[%s4274_s5 + $0x70] sm:$0xff] %vm430_vm1, %v3381_v3  ;;  %v2705_v61 = vpop.f32.mrb[15].mxu1 }
 0x1a0   : > { %2740 = vst.msk [vmem:[%s4274_s5 + $0x60] sm:$0xff] %vm430_vm1, %v2705_v61 }
 0x1a4   : > { %v3384_v21 = vpop.f32.mrb[16].mxu1 }
 0x1a5   : > { %2745 = vst.msk [vmem:[%s4274_s5 + $0x88] sm:$0xff] %vm430_vm1, %v3384_v21  ;;  %v2718_v22 = vpop.f32.mrb[17].mxu1 }
 0x1a6   : > { %2743 = vst.msk [vmem:[%s4274_s5 + $0x78] sm:$0xff] %vm430_vm1, %v2718_v22  ;;  %v3385_v57 = vpop.f32.mrb[18].mxu1 }
 0x1a7   : > { %v2721_v25 = vpop.f32.mrb[19].mxu1 }
 0x1a8   : > { %2744 = vst.msk [vmem:[%s4274_s5 + $0x80] sm:$0xff] %vm430_vm1, %v2721_v25 }
 0x1a9 PF: > { %s13_s16 = sadd.s32 1, %s3687_s16   ;;  %s4332_s12 = smov %s3679_s14 }
 0x1aa   : > { %p10_p8 = scmp.ge.s32.totalorder %s13_s16, 8   ;;  %s4333_s13 = smov %s3683_s15 }
 0x1ab   : > { %s4334_s14 = smov %s4337_s17  ;;  %s4335_s15 = smov %s4341_s18 }
 0x1ac   :  { %12 = sbr.rel (!%p10_p8) target bundleno = 3 (0x3), region = 68 }

</bundles_post_ra>
